<compile_context>
chip_gen: v7x
topology: tpu7x:2x2x1
jax: 0.10.0
libtpu: 0.0.40
codegen_flags: <defaults>
</compile_context>

<pallas_src>
import numpy as np
import jax
import jax.numpy as jnp
from jax.experimental import pallas as pl
from jax.experimental.pallas import tpu as pltpu

EPS = 1e-5
NEG_SLOPE = 0.01


# ------------------------------ fused kernel --------------------------------

def _build_fused_kernel(H, W, C, K):
    """Fused 2-block MiniInception forward for one sample.

    Internal activation layout: (C, H*W) f32 (spatial on lanes).  KxK convs use
    a flat zero-bordered scratch of shape (C, PAD + H*W + PAD); tap (kh, kw)
    is the static lane slice at offset PAD + (kh-P)*W + (kw-P).
    """
    HW = H * W
    P = (K - 1) // 2
    PAD = ((P * W + P + 127) // 128) * 128   # lane-aligned zero border per side

    def kernel(x_ref,
               w_b1s_ref, w_b1c1_ref, w_b1c2_ref,
               w_b2s1_ref, w_b2s2_ref, w_b2c1_ref, w_b2c2_ref,
               g_ref, b_ref, mask_ref,
               o_ref,
               pad_ref):
        inv_hw = jnp.float32(1.0 / HW)

        def inorm(acc, idx):
            # single fused lane-reduction for sum and sum-of-squares (biased var)
            stats = jnp.concatenate([acc, acc * acc], axis=0)        # (2C, HW)
            s = jnp.sum(stats, axis=1, keepdims=True) * inv_hw       # (2C, 1)
            mean, ex2 = s[:C], s[C:]
            var = ex2 - mean * mean
            scale = g_ref[:, idx:idx + 1] * jax.lax.rsqrt(var + EPS)  # (C, 1)
            shift = b_ref[:, idx:idx + 1] - mean * scale
            return acc * scale + shift

        def lrelu(y):
            return jnp.maximum(y, NEG_SLOPE * y)

        def conv1x1_in(x_cp, w_ref, idx):
            acc = jnp.dot(w_ref[...], x_cp, preferred_element_type=jnp.float32)
            return inorm(acc, idx)

        def convKxK_in(x_cp, w_ref, idx):
            # write the (C, HW) activation into the zero-bordered flat scratch
            pad_ref[:, PAD:PAD + HW] = x_cp
            patches = []
            for kh in range(K):
                for kw in range(K):
                    shift = (kh - P) * W + (kw - P)
                    patch = pad_ref[:, PAD + shift:PAD + shift + HW]   # (C, HW)
                    if kw != P:
                        # zero the taps whose column index falls outside [0, W)
                        patch = patch * mask_ref[kw:kw + 1, :]
                    patches.append(patch)
            col = jnp.concatenate(patches, axis=0)                     # (K*K*C, HW)
            acc = jnp.dot(w_ref[...], col, preferred_element_type=jnp.float32)
            return inorm(acc, idx)

        # zero ONLY the border strips; the interior is fully overwritten by
        # every convKxK_in call.  Scratch persists across (core-sharded) grid
        # steps, so do this every step (no pid==0 gating).
        zeros_border = jnp.zeros((C, PAD), jnp.float32)
        pad_ref[:, :PAD] = zeros_border
        pad_ref[:, PAD + HW:] = zeros_border

        x0 = x_ref[0].astype(jnp.float32)                              # (C, HW)

        # ---- block 1: projection skip (Cin != Cout) ----
        res1 = conv1x1_in(x0, w_b1s_ref, 0)                 # IN(conv1x1(x))
        h1 = lrelu(convKxK_in(x0, w_b1c1_ref, 1))           # conv1 + IN + LReLU
        y1 = lrelu(convKxK_in(h1, w_b1c2_ref, 2) + res1)    # conv2 + IN, +res, LReLU

        # ---- block 2: skip = two (1x1 conv + IN), residual = skip(y1) + y1 ----
        s1 = conv1x1_in(y1, w_b2s1_ref, 3)
        res2 = conv1x1_in(s1, w_b2s2_ref, 4) + y1
        h2 = lrelu(convKxK_in(y1, w_b2c1_ref, 5))
        y2 = lrelu(convKxK_in(h2, w_b2c2_ref, 6) + res2)

        o_ref[0] = y2.astype(o_ref.dtype)

    return kernel, PAD


# ------------------------------ wrapper --------------------------------------

def _prep_w1x1(w, cin_pad):
    """(1,1,Ci,Co) HWIO -> (Co, cin_pad), zero-padding the input channels."""
    w2 = w.reshape(w.shape[2], w.shape[3])                  # (Ci, Co)
    if w2.shape[0] < cin_pad:
        w2 = jnp.pad(w2, ((0, cin_pad - w2.shape[0]), (0, 0)))
    return jnp.transpose(w2)                                # (Co, Cpad)


def _prep_wkxk(w, cin_pad):
    """(K,K,Ci,Co) HWIO -> (Co, K*K*cin_pad), tap-major / channel-minor."""
    kh, kw, ci, co = w.shape
    if ci < cin_pad:
        w = jnp.pad(w, ((0, 0), (0, 0), (0, cin_pad - ci), (0, 0)))
    return jnp.transpose(w.reshape(kh * kw * cin_pad, co))  # (Co, K*K*Cpad)


def _build_col_masks(H, W, K):
    """(K, H*W) 0/1 mask per kw: 1 where the shifted column stays inside [0, W)."""
    P = (K - 1) // 2
    wcol = np.arange(H * W) % W
    m = np.zeros((K, H * W), np.float32)
    for kw in range(K):
        dw = kw - P
        m[kw] = ((wcol + dw >= 0) & (wcol + dw < W)).astype(np.float32)
    return jnp.asarray(m)


def stacked_residual_blocks_forward(x_nchw, params, *, k=3):
    """Fused forward of StackedResidualBlocks (2 x MiniInception), NCHW in/out."""
    N, Cin, H, W = x_nchw.shape
    Cout = params["b1_skip"]["w"].shape[-1]
    assert Cin <= Cout, "this configuration assumes input_channels <= output_channels"
    HW = H * W
    K = k

    # NCHW with flattened spatial already IS the lane-dense (C, HW) kernel layout.
    x = x_nchw.reshape(N, Cin, HW)
    if Cin < Cout:
        x = jnp.pad(x, ((0, 0), (0, Cout - Cin), (0, 0)))   # zero-pad channels

    stage_names = ["b1_skip", "b1_conv1", "b1_conv2",
                   "b2_skip1", "b2_skip2", "b2_conv1", "b2_conv2"]
    gammas = jnp.stack([params[s]["g"] for s in stage_names], axis=1)  # (Cout, 7)
    betas = jnp.stack([params[s]["b"] for s in stage_names], axis=1)   # (Cout, 7)

    weights = [
        _prep_w1x1(params["b1_skip"]["w"], Cout),    # 0
        _prep_wkxk(params["b1_conv1"]["w"], Cout),   # 1
        _prep_wkxk(params["b1_conv2"]["w"], Cout),   # 2
        _prep_w1x1(params["b2_skip1"]["w"], Cout),   # 3
        _prep_w1x1(params["b2_skip2"]["w"], Cout),   # 4
        _prep_wkxk(params["b2_conv1"]["w"], Cout),   # 5
        _prep_wkxk(params["b2_conv2"]["w"], Cout),   # 6
    ]
    masks = _build_col_masks(H, W, K)

    kernel, PAD = _build_fused_kernel(H, W, Cout, K)

    def const2d(n):
        return (0, 0)

    in_specs = ([pl.BlockSpec((1, Cout, HW), lambda n: (n, 0, 0))]
                + [pl.BlockSpec(w.shape, const2d) for w in weights]
                + [pl.BlockSpec(gammas.shape, const2d),
                   pl.BlockSpec(betas.shape, const2d),
                   pl.BlockSpec(masks.shape, const2d)])

    out = pl.pallas_call(
        kernel,
        out_shape=jax.ShapeDtypeStruct((N, Cout, HW), x_nchw.dtype),
        grid_spec=pltpu.PrefetchScalarGridSpec(
            num_scalar_prefetch=0,
            grid=(N,),
            in_specs=in_specs,
            out_specs=pl.BlockSpec((1, Cout, HW), lambda n: (n, 0, 0)),
            scratch_shapes=[pltpu.VMEM((Cout, 2 * PAD + HW), jnp.float32)],
        ),
        compiler_params=pltpu.CompilerParams(dimension_semantics=("parallel",)),
    )(x, *weights, gammas, betas, masks)

    # (N, Cout, H*W) is already NCHW once un-flattened.
    return out.reshape(N, Cout, H, W)


# ----------------------------- parameter init -------------------------------

def _conv_params(key, kh, kw, cin, cout):
    w = 0.1 * jax.random.normal(key, (kh, kw, cin, cout), jnp.float32)   # HWIO
    gamma = jnp.ones((cout,), jnp.float32)
    beta = jnp.zeros((cout,), jnp.float32)
    return {"w": w, "g": gamma, "b": beta}


def init_stacked_residual_blocks_params(key, in_ch=4, out_ch=8, k=3):
    keys = jax.random.split(key, 7)
    return {
        # block 1: Cin != Cout -> projection skip (1x1 conv + IN)
        "b1_conv1": _conv_params(keys[0], k, k, in_ch, out_ch),
        "b1_conv2": _conv_params(keys[1], k, k, out_ch, out_ch),
        "b1_skip":  _conv_params(keys[2], 1, 1, in_ch, out_ch),
        # block 2: Cin == Cout, stride 1 -> skip = two (1x1 conv + IN)
        "b2_conv1": _conv_params(keys[3], k, k, out_ch, out_ch),
        "b2_conv2": _conv_params(keys[4], k, k, out_ch, out_ch),
        "b2_skip1": _conv_params(keys[5], 1, 1, out_ch, out_ch),
        "b2_skip2": _conv_params(keys[6], 1, 1, out_ch, out_ch),
    }


# ------------------------------ pure-JAX reference --------------------------

def _ref_conv_norm(x, w, g, b, residual=None, apply_lrelu=False):
    y = jax.lax.conv_general_dilated(
        x, w, window_strides=(1, 1), padding="SAME",
        dimension_numbers=("NHWC", "HWIO", "NHWC"),
        precision=jax.lax.Precision.HIGHEST)
    mean = y.mean(axis=(1, 2), keepdims=True)
    var = ((y - mean) ** 2).mean(axis=(1, 2), keepdims=True)
    y = (y - mean) / jnp.sqrt(var + EPS) * g + b
    if residual is not None:
        y = y + residual
    if apply_lrelu:
        y = jnp.where(y >= 0, y, NEG_SLOPE * y)
    return y


def _ref_forward(x_nchw, p):
    x = jnp.transpose(x_nchw, (0, 2, 3, 1))
    # block 1
    res = _ref_conv_norm(x, p["b1_skip"]["w"], p["b1_skip"]["g"], p["b1_skip"]["b"])
    h = _ref_conv_norm(x, p["b1_conv1"]["w"], p["b1_conv1"]["g"], p["b1_conv1"]["b"],
                       apply_lrelu=True)
    x = _ref_conv_norm(h, p["b1_conv2"]["w"], p["b1_conv2"]["g"], p["b1_conv2"]["b"],
                       residual=res, apply_lrelu=True)
    # block 2
    s1 = _ref_conv_norm(x, p["b2_skip1"]["w"], p["b2_skip1"]["g"], p["b2_skip1"]["b"])
    res = _ref_conv_norm(s1, p["b2_skip2"]["w"], p["b2_skip2"]["g"], p["b2_skip2"]["b"],
                         residual=x)
    h = _ref_conv_norm(x, p["b2_conv1"]["w"], p["b2_conv1"]["g"], p["b2_conv1"]["b"],
                       apply_lrelu=True)
    x = _ref_conv_norm(h, p["b2_conv2"]["w"], p["b2_conv2"]["g"], p["b2_conv2"]["b"],
                       residual=res, apply_lrelu=True)
    return jnp.transpose(x, (0, 3, 1, 2))


# ---------------------------------- main -------------------------------------

if __name__ == "__main__":
    key = jax.random.PRNGKey(0)
    k_x, k_p = jax.random.split(key)

    N, Cin, H, W = 2, 4, 16, 16
    x_nchw = jax.random.normal(k_x, (N, Cin, H, W), jnp.float32)
    params = init_stacked_residual_blocks_params(k_p, in_ch=Cin, out_ch=8, k=3)

    fwd = jax.jit(stacked_residual_blocks_forward)
    out = jax.block_until_ready(fwd(x_nchw, params))

    ref = jax.block_until_ready(_ref_forward(x_nchw, params))

    assert out.shape == (N, 8, H, W), out.shape
    assert bool(jnp.all(jnp.isfinite(out)))
    np.testing.assert_allclose(np.asarray(out), np.asarray(ref), rtol=5e-2, atol=5e-2)

    print("KERNEL_OK")
</pallas_src>

<mosaic_0001>
module attributes {stable_mosaic.version = 11 : i64} {
  func.func @kernel(%arg0: i32, %arg1: memref<1x8x256xf32, #tpu.memory_space<vmem>>, %arg2: memref<8x8xf32, #tpu.memory_space<vmem>>, %arg3: memref<8x72xf32, #tpu.memory_space<vmem>>, %arg4: memref<8x72xf32, #tpu.memory_space<vmem>>, %arg5: memref<8x8xf32, #tpu.memory_space<vmem>>, %arg6: memref<8x8xf32, #tpu.memory_space<vmem>>, %arg7: memref<8x72xf32, #tpu.memory_space<vmem>>, %arg8: memref<8x72xf32, #tpu.memory_space<vmem>>, %arg9: memref<8x7xf32, #tpu.memory_space<vmem>>, %arg10: memref<8x7xf32, #tpu.memory_space<vmem>>, %arg11: memref<3x256xf32, #tpu.memory_space<vmem>>, %arg12: memref<1x8x256xf32, #tpu.memory_space<vmem>>, %arg13: memref<8x512xf32, #tpu.memory_space<vmem>>) attributes {dimension_semantics = [#tpu.dimension_semantics<parallel>], iteration_bounds = array<i64: 2>, scalar_prefetch = 0 : i64, scratch_operands = 1 : i64, tpu.core_type = #tpu.core_type<tc>, window_params = [{transform_indices = @transform_0, window_bounds = array<i64: 1, 8, 256>}, {pipeline_mode = #tpu.pipeline_mode<synchronous>, transform_indices = @transform_1, window_bounds = array<i64: 8, 8>}, {pipeline_mode = #tpu.pipeline_mode<synchronous>, transform_indices = @transform_2, window_bounds = array<i64: 8, 72>}, {pipeline_mode = #tpu.pipeline_mode<synchronous>, transform_indices = @transform_3, window_bounds = array<i64: 8, 72>}, {pipeline_mode = #tpu.pipeline_mode<synchronous>, transform_indices = @transform_4, window_bounds = array<i64: 8, 8>}, {pipeline_mode = #tpu.pipeline_mode<synchronous>, transform_indices = @transform_5, window_bounds = array<i64: 8, 8>}, {pipeline_mode = #tpu.pipeline_mode<synchronous>, transform_indices = @transform_6, window_bounds = array<i64: 8, 72>}, {pipeline_mode = #tpu.pipeline_mode<synchronous>, transform_indices = @transform_7, window_bounds = array<i64: 8, 72>}, {pipeline_mode = #tpu.pipeline_mode<synchronous>, transform_indices = @transform_8, window_bounds = array<i64: 8, 7>}, {pipeline_mode = #tpu.pipeline_mode<synchronous>, transform_indices = @transform_9, window_bounds = array<i64: 8, 7>}, {pipeline_mode = #tpu.pipeline_mode<synchronous>, transform_indices = @transform_10, window_bounds = array<i64: 3, 256>}, {transform_indices = @transform_11, window_bounds = array<i64: 1, 8, 256>}]} {
    %cst = arith.constant 0.000000e+00 : f32
    %0 = vector.broadcast %cst : f32 to vector<8x128xf32>
    %c0 = arith.constant 0 : index
    %c0_0 = arith.constant 0 : index
    %1 = vector.load %arg13[%c0, %c0_0] : memref<8x512xf32, #tpu.memory_space<vmem>>, vector<8x128xf32>
    tpu.vector_store %arg13[%c0, %c0_0], %0 {strides = array<i32>} : memref<8x512xf32, #tpu.memory_space<vmem>>, vector<8x128xf32>,
    %c0_1 = arith.constant 0 : index
    %c384 = arith.constant 384 : index
    %2 = vector.load %arg13[%c0_1, %c384] : memref<8x512xf32, #tpu.memory_space<vmem>>, vector<8x128xf32>
    tpu.vector_store %arg13[%c0_1, %c384], %0 {strides = array<i32>} : memref<8x512xf32, #tpu.memory_space<vmem>>, vector<8x128xf32>,
    %c0_2 = arith.constant 0 : index
    %c0_3 = arith.constant 0 : index
    %c0_4 = arith.constant 0 : index
    %3 = vector.load %arg1[%c0_2, %c0_3, %c0_4] : memref<1x8x256xf32, #tpu.memory_space<vmem>>, vector<1x8x256xf32>
    %4 = vector.shape_cast %3 : vector<1x8x256xf32> to vector<8x256xf32>
    %c0_5 = arith.constant 0 : index
    %c0_6 = arith.constant 0 : index
    %5 = vector.load %arg2[%c0_5, %c0_6] : memref<8x8xf32, #tpu.memory_space<vmem>>, vector<8x8xf32>
    %cst_7 = arith.constant dense<0.000000e+00> : vector<8x256xf32>
    %6 = tpu.matmul %5, %4, %cst_7 {dimension_numbers = #tpu.dot_dimension_numbers<[1], [0], [0], [1], [0, 0, 1, 1], [], []>} : vector<8x8xf32>, vector<8x256xf32>, vector<8x256xf32> -> vector<8x256xf32>
    %7 = arith.mulf %6, %6 : vector<8x256xf32>
    %8 = tpu.concatenate %6, %7 in 0 : vector<8x256xf32>, vector<8x256xf32> -> vector<16x256xf32>
    %cst_8 = arith.constant dense<0.000000e+00> : vector<16xf32>
    %9 = vector.multi_reduction <add>, %8, %cst_8 [1] : vector<16x256xf32> to vector<16xf32>
    %10 = vector.shape_cast %9 : vector<16xf32> to vector<16x1xf32>
    %cst_9 = arith.constant 3.906250e-03 : f32
    %11 = vector.broadcast %cst_9 : f32 to vector<16x1xf32>
    %12 = arith.mulf %10, %11 : vector<16x1xf32>
    %13 = vector.extract_strided_slice %12 {offsets = [0, 0], sizes = [8, 1], strides = [1, 1]} : vector<16x1xf32> to vector<8x1xf32>
    %14 = vector.extract_strided_slice %12 {offsets = [8, 0], sizes = [8, 1], strides = [1, 1]} : vector<16x1xf32> to vector<8x1xf32>
    %15 = arith.mulf %13, %13 : vector<8x1xf32>
    %16 = arith.subf %14, %15 : vector<8x1xf32>
    %c0_10 = arith.constant 0 : index
    %c0_11 = arith.constant 0 : index
    %17 = vector.load %arg9[%c0_10, %c0_11] : memref<8x7xf32, #tpu.memory_space<vmem>>, vector<8x1xf32>
    %cst_12 = arith.constant 9.99999974E-6 : f32
    %18 = vector.broadcast %cst_12 : f32 to vector<8x1xf32>
    %19 = arith.addf %16, %18 : vector<8x1xf32>
    %20 = math.rsqrt %19 : vector<8x1xf32>
    %21 = arith.mulf %17, %20 : vector<8x1xf32>
    %c0_13 = arith.constant 0 : index
    %c0_14 = arith.constant 0 : index
    %22 = vector.load %arg10[%c0_13, %c0_14] : memref<8x7xf32, #tpu.memory_space<vmem>>, vector<8x1xf32>
    %23 = arith.mulf %13, %21 : vector<8x1xf32>
    %24 = arith.subf %22, %23 : vector<8x1xf32>
    %25 = vector.broadcast %21 : vector<8x1xf32> to vector<8x256xf32>
    %26 = arith.mulf %6, %25 : vector<8x256xf32>
    %27 = vector.broadcast %24 : vector<8x1xf32> to vector<8x256xf32>
    %28 = arith.addf %26, %27 : vector<8x256xf32>
    %c0_15 = arith.constant 0 : index
    %c128 = arith.constant 128 : index
    %29 = vector.load %arg13[%c0_15, %c128] : memref<8x512xf32, #tpu.memory_space<vmem>>, vector<8x256xf32>
    tpu.vector_store %arg13[%c0_15, %c128], %4 {strides = array<i32>} : memref<8x512xf32, #tpu.memory_space<vmem>>, vector<8x256xf32>,
    %c0_16 = arith.constant 0 : index
    %c111 = arith.constant 111 : index
    %30 = vector.load %arg13[%c0_16, %c111] : memref<8x512xf32, #tpu.memory_space<vmem>>, vector<8x256xf32>
    %c0_17 = arith.constant 0 : index
    %c0_18 = arith.constant 0 : index
    %31 = vector.load %arg11[%c0_17, %c0_18] : memref<3x256xf32, #tpu.memory_space<vmem>>, vector<1x256xf32>
    %32 = vector.broadcast %31 : vector<1x256xf32> to vector<8x256xf32>
    %33 = arith.mulf %30, %32 : vector<8x256xf32>
    %c0_19 = arith.constant 0 : index
    %c112 = arith.constant 112 : index
    %34 = vector.load %arg13[%c0_19, %c112] : memref<8x512xf32, #tpu.memory_space<vmem>>, vector<8x256xf32>
    %c0_20 = arith.constant 0 : index
    %c113 = arith.constant 113 : index
    %35 = vector.load %arg13[%c0_20, %c113] : memref<8x512xf32, #tpu.memory_space<vmem>>, vector<8x256xf32>
    %c2 = arith.constant 2 : index
    %c0_21 = arith.constant 0 : index
    %36 = vector.load %arg11[%c2, %c0_21] : memref<3x256xf32, #tpu.memory_space<vmem>>, vector<1x256xf32>
    %37 = vector.broadcast %36 : vector<1x256xf32> to vector<8x256xf32>
    %38 = arith.mulf %35, %37 : vector<8x256xf32>
    %c0_22 = arith.constant 0 : index
    %c127 = arith.constant 127 : index
    %39 = vector.load %arg13[%c0_22, %c127] : memref<8x512xf32, #tpu.memory_space<vmem>>, vector<8x256xf32>
    %c0_23 = arith.constant 0 : index
    %c0_24 = arith.constant 0 : index
    %40 = vector.load %arg11[%c0_23, %c0_24] : memref<3x256xf32, #tpu.memory_space<vmem>>, vector<1x256xf32>
    %41 = vector.broadcast %40 : vector<1x256xf32> to vector<8x256xf32>
    %42 = arith.mulf %39, %41 : vector<8x256xf32>
    %c0_25 = arith.constant 0 : index
    %c128_26 = arith.constant 128 : index
    %43 = vector.load %arg13[%c0_25, %c128_26] : memref<8x512xf32, #tpu.memory_space<vmem>>, vector<8x256xf32>
    %c0_27 = arith.constant 0 : index
    %c129 = arith.constant 129 : index
    %44 = vector.load %arg13[%c0_27, %c129] : memref<8x512xf32, #tpu.memory_space<vmem>>, vector<8x256xf32>
    %c2_28 = arith.constant 2 : index
    %c0_29 = arith.constant 0 : index
    %45 = vector.load %arg11[%c2_28, %c0_29] : memref<3x256xf32, #tpu.memory_space<vmem>>, vector<1x256xf32>
    %46 = vector.broadcast %45 : vector<1x256xf32> to vector<8x256xf32>
    %47 = arith.mulf %44, %46 : vector<8x256xf32>
    %c0_30 = arith.constant 0 : index
    %c143 = arith.constant 143 : index
    %48 = vector.load %arg13[%c0_30, %c143] : memref<8x512xf32, #tpu.memory_space<vmem>>, vector<8x256xf32>
    %c0_31 = arith.constant 0 : index
    %c0_32 = arith.constant 0 : index
    %49 = vector.load %arg11[%c0_31, %c0_32] : memref<3x256xf32, #tpu.memory_space<vmem>>, vector<1x256xf32>
    %50 = vector.broadcast %49 : vector<1x256xf32> to vector<8x256xf32>
    %51 = arith.mulf %48, %50 : vector<8x256xf32>
    %c0_33 = arith.constant 0 : index
    %c144 = arith.constant 144 : index
    %52 = vector.load %arg13[%c0_33, %c144] : memref<8x512xf32, #tpu.memory_space<vmem>>, vector<8x256xf32>
    %c0_34 = arith.constant 0 : index
    %c145 = arith.constant 145 : index
    %53 = vector.load %arg13[%c0_34, %c145] : memref<8x512xf32, #tpu.memory_space<vmem>>, vector<8x256xf32>
    %c2_35 = arith.constant 2 : index
    %c0_36 = arith.constant 0 : index
    %54 = vector.load %arg11[%c2_35, %c0_36] : memref<3x256xf32, #tpu.memory_space<vmem>>, vector<1x256xf32>
    %55 = vector.broadcast %54 : vector<1x256xf32> to vector<8x256xf32>
    %56 = arith.mulf %53, %55 : vector<8x256xf32>
    %57 = tpu.concatenate %33, %34, %38, %42, %43, %47, %51, %52, %56 in 0 : vector<8x256xf32>, vector<8x256xf32>, vector<8x256xf32>, vector<8x256xf32>, vector<8x256xf32>, vector<8x256xf32>, vector<8x256xf32>, vector<8x256xf32>, vector<8x256xf32> -> vector<72x256xf32>
    %c0_37 = arith.constant 0 : index
    %c0_38 = arith.constant 0 : index
    %58 = vector.load %arg3[%c0_37, %c0_38] : memref<8x72xf32, #tpu.memory_space<vmem>>, vector<8x72xf32>
    %cst_39 = arith.constant dense<0.000000e+00> : vector<8x256xf32>
    %59 = tpu.matmul %58, %57, %cst_39 {dimension_numbers = #tpu.dot_dimension_numbers<[1], [0], [0], [1], [0, 0, 1, 1], [], []>} : vector<8x72xf32>, vector<72x256xf32>, vector<8x256xf32> -> vector<8x256xf32>
    %60 = arith.mulf %59, %59 : vector<8x256xf32>
    %61 = tpu.concatenate %59, %60 in 0 : vector<8x256xf32>, vector<8x256xf32> -> vector<16x256xf32>
    %cst_40 = arith.constant dense<0.000000e+00> : vector<16xf32>
    %62 = vector.multi_reduction <add>, %61, %cst_40 [1] : vector<16x256xf32> to vector<16xf32>
    %63 = vector.shape_cast %62 : vector<16xf32> to vector<16x1xf32>
    %cst_41 = arith.constant 3.906250e-03 : f32
    %64 = vector.broadcast %cst_41 : f32 to vector<16x1xf32>
    %65 = arith.mulf %63, %64 : vector<16x1xf32>
    %66 = vector.extract_strided_slice %65 {offsets = [0, 0], sizes = [8, 1], strides = [1, 1]} : vector<16x1xf32> to vector<8x1xf32>
    %67 = vector.extract_strided_slice %65 {offsets = [8, 0], sizes = [8, 1], strides = [1, 1]} : vector<16x1xf32> to vector<8x1xf32>
    %68 = arith.mulf %66, %66 : vector<8x1xf32>
    %69 = arith.subf %67, %68 : vector<8x1xf32>
    %c0_42 = arith.constant 0 : index
    %c1 = arith.constant 1 : index
    %70 = vector.load %arg9[%c0_42, %c1] : memref<8x7xf32, #tpu.memory_space<vmem>>, vector<8x1xf32>
    %cst_43 = arith.constant 9.99999974E-6 : f32
    %71 = vector.broadcast %cst_43 : f32 to vector<8x1xf32>
    %72 = arith.addf %69, %71 : vector<8x1xf32>
    %73 = math.rsqrt %72 : vector<8x1xf32>
    %74 = arith.mulf %70, %73 : vector<8x1xf32>
    %c0_44 = arith.constant 0 : index
    %c1_45 = arith.constant 1 : index
    %75 = vector.load %arg10[%c0_44, %c1_45] : memref<8x7xf32, #tpu.memory_space<vmem>>, vector<8x1xf32>
    %76 = arith.mulf %66, %74 : vector<8x1xf32>
    %77 = arith.subf %75, %76 : vector<8x1xf32>
    %78 = vector.broadcast %74 : vector<8x1xf32> to vector<8x256xf32>
    %79 = arith.mulf %59, %78 : vector<8x256xf32>
    %80 = vector.broadcast %77 : vector<8x1xf32> to vector<8x256xf32>
    %81 = arith.addf %79, %80 : vector<8x256xf32>
    %cst_46 = arith.constant 0.00999999977 : f32
    %82 = vector.broadcast %cst_46 : f32 to vector<8x256xf32>
    %83 = arith.mulf %82, %81 : vector<8x256xf32>
    %84 = arith.maximumf %81, %83 : vector<8x256xf32>
    %c0_47 = arith.constant 0 : index
    %c128_48 = arith.constant 128 : index
    %85 = vector.load %arg13[%c0_47, %c128_48] : memref<8x512xf32, #tpu.memory_space<vmem>>, vector<8x256xf32>
    tpu.vector_store %arg13[%c0_47, %c128_48], %84 {strides = array<i32>} : memref<8x512xf32, #tpu.memory_space<vmem>>, vector<8x256xf32>,
    %c0_49 = arith.constant 0 : index
    %c111_50 = arith.constant 111 : index
    %86 = vector.load %arg13[%c0_49, %c111_50] : memref<8x512xf32, #tpu.memory_space<vmem>>, vector<8x256xf32>
    %c0_51 = arith.constant 0 : index
    %c0_52 = arith.constant 0 : index
    %87 = vector.load %arg11[%c0_51, %c0_52] : memref<3x256xf32, #tpu.memory_space<vmem>>, vector<1x256xf32>
    %88 = vector.broadcast %87 : vector<1x256xf32> to vector<8x256xf32>
    %89 = arith.mulf %86, %88 : vector<8x256xf32>
    %c0_53 = arith.constant 0 : index
    %c112_54 = arith.constant 112 : index
    %90 = vector.load %arg13[%c0_53, %c112_54] : memref<8x512xf32, #tpu.memory_space<vmem>>, vector<8x256xf32>
    %c0_55 = arith.constant 0 : index
    %c113_56 = arith.constant 113 : index
    %91 = vector.load %arg13[%c0_55, %c113_56] : memref<8x512xf32, #tpu.memory_space<vmem>>, vector<8x256xf32>
    %c2_57 = arith.constant 2 : index
    %c0_58 = arith.constant 0 : index
    %92 = vector.load %arg11[%c2_57, %c0_58] : memref<3x256xf32, #tpu.memory_space<vmem>>, vector<1x256xf32>
    %93 = vector.broadcast %92 : vector<1x256xf32> to vector<8x256xf32>
    %94 = arith.mulf %91, %93 : vector<8x256xf32>
    %c0_59 = arith.constant 0 : index
    %c127_60 = arith.constant 127 : index
    %95 = vector.load %arg13[%c0_59, %c127_60] : memref<8x512xf32, #tpu.memory_space<vmem>>, vector<8x256xf32>
    %c0_61 = arith.constant 0 : index
    %c0_62 = arith.constant 0 : index
    %96 = vector.load %arg11[%c0_61, %c0_62] : memref<3x256xf32, #tpu.memory_space<vmem>>, vector<1x256xf32>
    %97 = vector.broadcast %96 : vector<1x256xf32> to vector<8x256xf32>
    %98 = arith.mulf %95, %97 : vector<8x256xf32>
    %c0_63 = arith.constant 0 : index
    %c128_64 = arith.constant 128 : index
    %99 = vector.load %arg13[%c0_63, %c128_64] : memref<8x512xf32, #tpu.memory_space<vmem>>, vector<8x256xf32>
    %c0_65 = arith.constant 0 : index
    %c129_66 = arith.constant 129 : index
    %100 = vector.load %arg13[%c0_65, %c129_66] : memref<8x512xf32, #tpu.memory_space<vmem>>, vector<8x256xf32>
    %c2_67 = arith.constant 2 : index
    %c0_68 = arith.constant 0 : index
    %101 = vector.load %arg11[%c2_67, %c0_68] : memref<3x256xf32, #tpu.memory_space<vmem>>, vector<1x256xf32>
    %102 = vector.broadcast %101 : vector<1x256xf32> to vector<8x256xf32>
    %103 = arith.mulf %100, %102 : vector<8x256xf32>
    %c0_69 = arith.constant 0 : index
    %c143_70 = arith.constant 143 : index
    %104 = vector.load %arg13[%c0_69, %c143_70] : memref<8x512xf32, #tpu.memory_space<vmem>>, vector<8x256xf32>
    %c0_71 = arith.constant 0 : index
    %c0_72 = arith.constant 0 : index
    %105 = vector.load %arg11[%c0_71, %c0_72] : memref<3x256xf32, #tpu.memory_space<vmem>>, vector<1x256xf32>
    %106 = vector.broadcast %105 : vector<1x256xf32> to vector<8x256xf32>
    %107 = arith.mulf %104, %106 : vector<8x256xf32>
    %c0_73 = arith.constant 0 : index
    %c144_74 = arith.constant 144 : index
    %108 = vector.load %arg13[%c0_73, %c144_74] : memref<8x512xf32, #tpu.memory_space<vmem>>, vector<8x256xf32>
    %c0_75 = arith.constant 0 : index
    %c145_76 = arith.constant 145 : index
    %109 = vector.load %arg13[%c0_75, %c145_76] : memref<8x512xf32, #tpu.memory_space<vmem>>, vector<8x256xf32>
    %c2_77 = arith.constant 2 : index
    %c0_78 = arith.constant 0 : index
    %110 = vector.load %arg11[%c2_77, %c0_78] : memref<3x256xf32, #tpu.memory_space<vmem>>, vector<1x256xf32>
    %111 = vector.broadcast %110 : vector<1x256xf32> to vector<8x256xf32>
    %112 = arith.mulf %109, %111 : vector<8x256xf32>
    %113 = tpu.concatenate %89, %90, %94, %98, %99, %103, %107, %108, %112 in 0 : vector<8x256xf32>, vector<8x256xf32>, vector<8x256xf32>, vector<8x256xf32>, vector<8x256xf32>, vector<8x256xf32>, vector<8x256xf32>, vector<8x256xf32>, vector<8x256xf32> -> vector<72x256xf32>
    %c0_79 = arith.constant 0 : index
    %c0_80 = arith.constant 0 : index
    %114 = vector.load %arg4[%c0_79, %c0_80] : memref<8x72xf32, #tpu.memory_space<vmem>>, vector<8x72xf32>
    %cst_81 = arith.constant dense<0.000000e+00> : vector<8x256xf32>
    %115 = tpu.matmul %114, %113, %cst_81 {dimension_numbers = #tpu.dot_dimension_numbers<[1], [0], [0], [1], [0, 0, 1, 1], [], []>} : vector<8x72xf32>, vector<72x256xf32>, vector<8x256xf32> -> vector<8x256xf32>
    %116 = arith.mulf %115, %115 : vector<8x256xf32>
    %117 = tpu.concatenate %115, %116 in 0 : vector<8x256xf32>, vector<8x256xf32> -> vector<16x256xf32>
    %cst_82 = arith.constant dense<0.000000e+00> : vector<16xf32>
    %118 = vector.multi_reduction <add>, %117, %cst_82 [1] : vector<16x256xf32> to vector<16xf32>
    %119 = vector.shape_cast %118 : vector<16xf32> to vector<16x1xf32>
    %cst_83 = arith.constant 3.906250e-03 : f32
    %120 = vector.broadcast %cst_83 : f32 to vector<16x1xf32>
    %121 = arith.mulf %119, %120 : vector<16x1xf32>
    %122 = vector.extract_strided_slice %121 {offsets = [0, 0], sizes = [8, 1], strides = [1, 1]} : vector<16x1xf32> to vector<8x1xf32>
    %123 = vector.extract_strided_slice %121 {offsets = [8, 0], sizes = [8, 1], strides = [1, 1]} : vector<16x1xf32> to vector<8x1xf32>
    %124 = arith.mulf %122, %122 : vector<8x1xf32>
    %125 = arith.subf %123, %124 : vector<8x1xf32>
    %c0_84 = arith.constant 0 : index
    %c2_85 = arith.constant 2 : index
    %126 = vector.load %arg9[%c0_84, %c2_85] : memref<8x7xf32, #tpu.memory_space<vmem>>, vector<8x1xf32>
    %cst_86 = arith.constant 9.99999974E-6 : f32
    %127 = vector.broadcast %cst_86 : f32 to vector<8x1xf32>
    %128 = arith.addf %125, %127 : vector<8x1xf32>
    %129 = math.rsqrt %128 : vector<8x1xf32>
    %130 = arith.mulf %126, %129 : vector<8x1xf32>
    %c0_87 = arith.constant 0 : index
    %c2_88 = arith.constant 2 : index
    %131 = vector.load %arg10[%c0_87, %c2_88] : memref<8x7xf32, #tpu.memory_space<vmem>>, vector<8x1xf32>
    %132 = arith.mulf %122, %130 : vector<8x1xf32>
    %133 = arith.subf %131, %132 : vector<8x1xf32>
    %134 = vector.broadcast %130 : vector<8x1xf32> to vector<8x256xf32>
    %135 = arith.mulf %115, %134 : vector<8x256xf32>
    %136 = vector.broadcast %133 : vector<8x1xf32> to vector<8x256xf32>
    %137 = arith.addf %135, %136 : vector<8x256xf32>
    %138 = arith.addf %137, %28 : vector<8x256xf32>
    %cst_89 = arith.constant 0.00999999977 : f32
    %139 = vector.broadcast %cst_89 : f32 to vector<8x256xf32>
    %140 = arith.mulf %139, %138 : vector<8x256xf32>
    %141 = arith.maximumf %138, %140 : vector<8x256xf32>
    %c0_90 = arith.constant 0 : index
    %c0_91 = arith.constant 0 : index
    %142 = vector.load %arg5[%c0_90, %c0_91] : memref<8x8xf32, #tpu.memory_space<vmem>>, vector<8x8xf32>
    %cst_92 = arith.constant dense<0.000000e+00> : vector<8x256xf32>
    %143 = tpu.matmul %142, %141, %cst_92 {dimension_numbers = #tpu.dot_dimension_numbers<[1], [0], [0], [1], [0, 0, 1, 1], [], []>} : vector<8x8xf32>, vector<8x256xf32>, vector<8x256xf32> -> vector<8x256xf32>
    %144 = arith.mulf %143, %143 : vector<8x256xf32>
    %145 = tpu.concatenate %143, %144 in 0 : vector<8x256xf32>, vector<8x256xf32> -> vector<16x256xf32>
    %cst_93 = arith.constant dense<0.000000e+00> : vector<16xf32>
    %146 = vector.multi_reduction <add>, %145, %cst_93 [1] : vector<16x256xf32> to vector<16xf32>
    %147 = vector.shape_cast %146 : vector<16xf32> to vector<16x1xf32>
    %cst_94 = arith.constant 3.906250e-03 : f32
    %148 = vector.broadcast %cst_94 : f32 to vector<16x1xf32>
    %149 = arith.mulf %147, %148 : vector<16x1xf32>
    %150 = vector.extract_strided_slice %149 {offsets = [0, 0], sizes = [8, 1], strides = [1, 1]} : vector<16x1xf32> to vector<8x1xf32>
    %151 = vector.extract_strided_slice %149 {offsets = [8, 0], sizes = [8, 1], strides = [1, 1]} : vector<16x1xf32> to vector<8x1xf32>
    %152 = arith.mulf %150, %150 : vector<8x1xf32>
    %153 = arith.subf %151, %152 : vector<8x1xf32>
    %c0_95 = arith.constant 0 : index
    %c3 = arith.constant 3 : index
    %154 = vector.load %arg9[%c0_95, %c3] : memref<8x7xf32, #tpu.memory_space<vmem>>, vector<8x1xf32>
    %cst_96 = arith.constant 9.99999974E-6 : f32
    %155 = vector.broadcast %cst_96 : f32 to vector<8x1xf32>
    %156 = arith.addf %153, %155 : vector<8x1xf32>
    %157 = math.rsqrt %156 : vector<8x1xf32>
    %158 = arith.mulf %154, %157 : vector<8x1xf32>
    %c0_97 = arith.constant 0 : index
    %c3_98 = arith.constant 3 : index
    %159 = vector.load %arg10[%c0_97, %c3_98] : memref<8x7xf32, #tpu.memory_space<vmem>>, vector<8x1xf32>
    %160 = arith.mulf %150, %158 : vector<8x1xf32>
    %161 = arith.subf %159, %160 : vector<8x1xf32>
    %162 = vector.broadcast %158 : vector<8x1xf32> to vector<8x256xf32>
    %163 = arith.mulf %143, %162 : vector<8x256xf32>
    %164 = vector.broadcast %161 : vector<8x1xf32> to vector<8x256xf32>
    %165 = arith.addf %163, %164 : vector<8x256xf32>
    %c0_99 = arith.constant 0 : index
    %c0_100 = arith.constant 0 : index
    %166 = vector.load %arg6[%c0_99, %c0_100] : memref<8x8xf32, #tpu.memory_space<vmem>>, vector<8x8xf32>
    %cst_101 = arith.constant dense<0.000000e+00> : vector<8x256xf32>
    %167 = tpu.matmul %166, %165, %cst_101 {dimension_numbers = #tpu.dot_dimension_numbers<[1], [0], [0], [1], [0, 0, 1, 1], [], []>} : vector<8x8xf32>, vector<8x256xf32>, vector<8x256xf32> -> vector<8x256xf32>
    %168 = arith.mulf %167, %167 : vector<8x256xf32>
    %169 = tpu.concatenate %167, %168 in 0 : vector<8x256xf32>, vector<8x256xf32> -> vector<16x256xf32>
    %cst_102 = arith.constant dense<0.000000e+00> : vector<16xf32>
    %170 = vector.multi_reduction <add>, %169, %cst_102 [1] : vector<16x256xf32> to vector<16xf32>
    %171 = vector.shape_cast %170 : vector<16xf32> to vector<16x1xf32>
    %cst_103 = arith.constant 3.906250e-03 : f32
    %172 = vector.broadcast %cst_103 : f32 to vector<16x1xf32>
    %173 = arith.mulf %171, %172 : vector<16x1xf32>
    %174 = vector.extract_strided_slice %173 {offsets = [0, 0], sizes = [8, 1], strides = [1, 1]} : vector<16x1xf32> to vector<8x1xf32>
    %175 = vector.extract_strided_slice %173 {offsets = [8, 0], sizes = [8, 1], strides = [1, 1]} : vector<16x1xf32> to vector<8x1xf32>
    %176 = arith.mulf %174, %174 : vector<8x1xf32>
    %177 = arith.subf %175, %176 : vector<8x1xf32>
    %c0_104 = arith.constant 0 : index
    %c4 = arith.constant 4 : index
    %178 = vector.load %arg9[%c0_104, %c4] : memref<8x7xf32, #tpu.memory_space<vmem>>, vector<8x1xf32>
    %cst_105 = arith.constant 9.99999974E-6 : f32
    %179 = vector.broadcast %cst_105 : f32 to vector<8x1xf32>
    %180 = arith.addf %177, %179 : vector<8x1xf32>
    %181 = math.rsqrt %180 : vector<8x1xf32>
    %182 = arith.mulf %178, %181 : vector<8x1xf32>
    %c0_106 = arith.constant 0 : index
    %c4_107 = arith.constant 4 : index
    %183 = vector.load %arg10[%c0_106, %c4_107] : memref<8x7xf32, #tpu.memory_space<vmem>>, vector<8x1xf32>
    %184 = arith.mulf %174, %182 : vector<8x1xf32>
    %185 = arith.subf %183, %184 : vector<8x1xf32>
    %186 = vector.broadcast %182 : vector<8x1xf32> to vector<8x256xf32>
    %187 = arith.mulf %167, %186 : vector<8x256xf32>
    %188 = vector.broadcast %185 : vector<8x1xf32> to vector<8x256xf32>
    %189 = arith.addf %187, %188 : vector<8x256xf32>
    %190 = arith.addf %189, %141 : vector<8x256xf32>
    %c0_108 = arith.constant 0 : index
    %c128_109 = arith.constant 128 : index
    %191 = vector.load %arg13[%c0_108, %c128_109] : memref<8x512xf32, #tpu.memory_space<vmem>>, vector<8x256xf32>
    tpu.vector_store %arg13[%c0_108, %c128_109], %141 {strides = array<i32>} : memref<8x512xf32, #tpu.memory_space<vmem>>, vector<8x256xf32>,
    %c0_110 = arith.constant 0 : index
    %c111_111 = arith.constant 111 : index
    %192 = vector.load %arg13[%c0_110, %c111_111] : memref<8x512xf32, #tpu.memory_space<vmem>>, vector<8x256xf32>
    %c0_112 = arith.constant 0 : index
    %c0_113 = arith.constant 0 : index
    %193 = vector.load %arg11[%c0_112, %c0_113] : memref<3x256xf32, #tpu.memory_space<vmem>>, vector<1x256xf32>
    %194 = vector.broadcast %193 : vector<1x256xf32> to vector<8x256xf32>
    %195 = arith.mulf %192, %194 : vector<8x256xf32>
    %c0_114 = arith.constant 0 : index
    %c112_115 = arith.constant 112 : index
    %196 = vector.load %arg13[%c0_114, %c112_115] : memref<8x512xf32, #tpu.memory_space<vmem>>, vector<8x256xf32>
    %c0_116 = arith.constant 0 : index
    %c113_117 = arith.constant 113 : index
    %197 = vector.load %arg13[%c0_116, %c113_117] : memref<8x512xf32, #tpu.memory_space<vmem>>, vector<8x256xf32>
    %c2_118 = arith.constant 2 : index
    %c0_119 = arith.constant 0 : index
    %198 = vector.load %arg11[%c2_118, %c0_119] : memref<3x256xf32, #tpu.memory_space<vmem>>, vector<1x256xf32>
    %199 = vector.broadcast %198 : vector<1x256xf32> to vector<8x256xf32>
    %200 = arith.mulf %197, %199 : vector<8x256xf32>
    %c0_120 = arith.constant 0 : index
    %c127_121 = arith.constant 127 : index
    %201 = vector.load %arg13[%c0_120, %c127_121] : memref<8x512xf32, #tpu.memory_space<vmem>>, vector<8x256xf32>
    %c0_122 = arith.constant 0 : index
    %c0_123 = arith.constant 0 : index
    %202 = vector.load %arg11[%c0_122, %c0_123] : memref<3x256xf32, #tpu.memory_space<vmem>>, vector<1x256xf32>
    %203 = vector.broadcast %202 : vector<1x256xf32> to vector<8x256xf32>
    %204 = arith.mulf %201, %203 : vector<8x256xf32>
    %c0_124 = arith.constant 0 : index
    %c128_125 = arith.constant 128 : index
    %205 = vector.load %arg13[%c0_124, %c128_125] : memref<8x512xf32, #tpu.memory_space<vmem>>, vector<8x256xf32>
    %c0_126 = arith.constant 0 : index
    %c129_127 = arith.constant 129 : index
    %206 = vector.load %arg13[%c0_126, %c129_127] : memref<8x512xf32, #tpu.memory_space<vmem>>, vector<8x256xf32>
    %c2_128 = arith.constant 2 : index
    %c0_129 = arith.constant 0 : index
    %207 = vector.load %arg11[%c2_128, %c0_129] : memref<3x256xf32, #tpu.memory_space<vmem>>, vector<1x256xf32>
    %208 = vector.broadcast %207 : vector<1x256xf32> to vector<8x256xf32>
    %209 = arith.mulf %206, %208 : vector<8x256xf32>
    %c0_130 = arith.constant 0 : index
    %c143_131 = arith.constant 143 : index
    %210 = vector.load %arg13[%c0_130, %c143_131] : memref<8x512xf32, #tpu.memory_space<vmem>>, vector<8x256xf32>
    %c0_132 = arith.constant 0 : index
    %c0_133 = arith.constant 0 : index
    %211 = vector.load %arg11[%c0_132, %c0_133] : memref<3x256xf32, #tpu.memory_space<vmem>>, vector<1x256xf32>
    %212 = vector.broadcast %211 : vector<1x256xf32> to vector<8x256xf32>
    %213 = arith.mulf %210, %212 : vector<8x256xf32>
    %c0_134 = arith.constant 0 : index
    %c144_135 = arith.constant 144 : index
    %214 = vector.load %arg13[%c0_134, %c144_135] : memref<8x512xf32, #tpu.memory_space<vmem>>, vector<8x256xf32>
    %c0_136 = arith.constant 0 : index
    %c145_137 = arith.constant 145 : index
    %215 = vector.load %arg13[%c0_136, %c145_137] : memref<8x512xf32, #tpu.memory_space<vmem>>, vector<8x256xf32>
    %c2_138 = arith.constant 2 : index
    %c0_139 = arith.constant 0 : index
    %216 = vector.load %arg11[%c2_138, %c0_139] : memref<3x256xf32, #tpu.memory_space<vmem>>, vector<1x256xf32>
    %217 = vector.broadcast %216 : vector<1x256xf32> to vector<8x256xf32>
    %218 = arith.mulf %215, %217 : vector<8x256xf32>
    %219 = tpu.concatenate %195, %196, %200, %204, %205, %209, %213, %214, %218 in 0 : vector<8x256xf32>, vector<8x256xf32>, vector<8x256xf32>, vector<8x256xf32>, vector<8x256xf32>, vector<8x256xf32>, vector<8x256xf32>, vector<8x256xf32>, vector<8x256xf32> -> vector<72x256xf32>
    %c0_140 = arith.constant 0 : index
    %c0_141 = arith.constant 0 : index
    %220 = vector.load %arg7[%c0_140, %c0_141] : memref<8x72xf32, #tpu.memory_space<vmem>>, vector<8x72xf32>
    %cst_142 = arith.constant dense<0.000000e+00> : vector<8x256xf32>
    %221 = tpu.matmul %220, %219, %cst_142 {dimension_numbers = #tpu.dot_dimension_numbers<[1], [0], [0], [1], [0, 0, 1, 1], [], []>} : vector<8x72xf32>, vector<72x256xf32>, vector<8x256xf32> -> vector<8x256xf32>
    %222 = arith.mulf %221, %221 : vector<8x256xf32>
    %223 = tpu.concatenate %221, %222 in 0 : vector<8x256xf32>, vector<8x256xf32> -> vector<16x256xf32>
    %cst_143 = arith.constant dense<0.000000e+00> : vector<16xf32>
    %224 = vector.multi_reduction <add>, %223, %cst_143 [1] : vector<16x256xf32> to vector<16xf32>
    %225 = vector.shape_cast %224 : vector<16xf32> to vector<16x1xf32>
    %cst_144 = arith.constant 3.906250e-03 : f32
    %226 = vector.broadcast %cst_144 : f32 to vector<16x1xf32>
    %227 = arith.mulf %225, %226 : vector<16x1xf32>
    %228 = vector.extract_strided_slice %227 {offsets = [0, 0], sizes = [8, 1], strides = [1, 1]} : vector<16x1xf32> to vector<8x1xf32>
    %229 = vector.extract_strided_slice %227 {offsets = [8, 0], sizes = [8, 1], strides = [1, 1]} : vector<16x1xf32> to vector<8x1xf32>
    %230 = arith.mulf %228, %228 : vector<8x1xf32>
    %231 = arith.subf %229, %230 : vector<8x1xf32>
    %c0_145 = arith.constant 0 : index
    %c5 = arith.constant 5 : index
    %232 = vector.load %arg9[%c0_145, %c5] : memref<8x7xf32, #tpu.memory_space<vmem>>, vector<8x1xf32>
    %cst_146 = arith.constant 9.99999974E-6 : f32
    %233 = vector.broadcast %cst_146 : f32 to vector<8x1xf32>
    %234 = arith.addf %231, %233 : vector<8x1xf32>
    %235 = math.rsqrt %234 : vector<8x1xf32>
    %236 = arith.mulf %232, %235 : vector<8x1xf32>
    %c0_147 = arith.constant 0 : index
    %c5_148 = arith.constant 5 : index
    %237 = vector.load %arg10[%c0_147, %c5_148] : memref<8x7xf32, #tpu.memory_space<vmem>>, vector<8x1xf32>
    %238 = arith.mulf %228, %236 : vector<8x1xf32>
    %239 = arith.subf %237, %238 : vector<8x1xf32>
    %240 = vector.broadcast %236 : vector<8x1xf32> to vector<8x256xf32>
    %241 = arith.mulf %221, %240 : vector<8x256xf32>
    %242 = vector.broadcast %239 : vector<8x1xf32> to vector<8x256xf32>
    %243 = arith.addf %241, %242 : vector<8x256xf32>
    %cst_149 = arith.constant 0.00999999977 : f32
    %244 = vector.broadcast %cst_149 : f32 to vector<8x256xf32>
    %245 = arith.mulf %244, %243 : vector<8x256xf32>
    %246 = arith.maximumf %243, %245 : vector<8x256xf32>
    %c0_150 = arith.constant 0 : index
    %c128_151 = arith.constant 128 : index
    %247 = vector.load %arg13[%c0_150, %c128_151] : memref<8x512xf32, #tpu.memory_space<vmem>>, vector<8x256xf32>
    tpu.vector_store %arg13[%c0_150, %c128_151], %246 {strides = array<i32>} : memref<8x512xf32, #tpu.memory_space<vmem>>, vector<8x256xf32>,
    %c0_152 = arith.constant 0 : index
    %c111_153 = arith.constant 111 : index
    %248 = vector.load %arg13[%c0_152, %c111_153] : memref<8x512xf32, #tpu.memory_space<vmem>>, vector<8x256xf32>
    %c0_154 = arith.constant 0 : index
    %c0_155 = arith.constant 0 : index
    %249 = vector.load %arg11[%c0_154, %c0_155] : memref<3x256xf32, #tpu.memory_space<vmem>>, vector<1x256xf32>
    %250 = vector.broadcast %249 : vector<1x256xf32> to vector<8x256xf32>
    %251 = arith.mulf %248, %250 : vector<8x256xf32>
    %c0_156 = arith.constant 0 : index
    %c112_157 = arith.constant 112 : index
    %252 = vector.load %arg13[%c0_156, %c112_157] : memref<8x512xf32, #tpu.memory_space<vmem>>, vector<8x256xf32>
    %c0_158 = arith.constant 0 : index
    %c113_159 = arith.constant 113 : index
    %253 = vector.load %arg13[%c0_158, %c113_159] : memref<8x512xf32, #tpu.memory_space<vmem>>, vector<8x256xf32>
    %c2_160 = arith.constant 2 : index
    %c0_161 = arith.constant 0 : index
    %254 = vector.load %arg11[%c2_160, %c0_161] : memref<3x256xf32, #tpu.memory_space<vmem>>, vector<1x256xf32>
    %255 = vector.broadcast %254 : vector<1x256xf32> to vector<8x256xf32>
    %256 = arith.mulf %253, %255 : vector<8x256xf32>
    %c0_162 = arith.constant 0 : index
    %c127_163 = arith.constant 127 : index
    %257 = vector.load %arg13[%c0_162, %c127_163] : memref<8x512xf32, #tpu.memory_space<vmem>>, vector<8x256xf32>
    %c0_164 = arith.constant 0 : index
    %c0_165 = arith.constant 0 : index
    %258 = vector.load %arg11[%c0_164, %c0_165] : memref<3x256xf32, #tpu.memory_space<vmem>>, vector<1x256xf32>
    %259 = vector.broadcast %258 : vector<1x256xf32> to vector<8x256xf32>
    %260 = arith.mulf %257, %259 : vector<8x256xf32>
    %c0_166 = arith.constant 0 : index
    %c128_167 = arith.constant 128 : index
    %261 = vector.load %arg13[%c0_166, %c128_167] : memref<8x512xf32, #tpu.memory_space<vmem>>, vector<8x256xf32>
    %c0_168 = arith.constant 0 : index
    %c129_169 = arith.constant 129 : index
    %262 = vector.load %arg13[%c0_168, %c129_169] : memref<8x512xf32, #tpu.memory_space<vmem>>, vector<8x256xf32>
    %c2_170 = arith.constant 2 : index
    %c0_171 = arith.constant 0 : index
    %263 = vector.load %arg11[%c2_170, %c0_171] : memref<3x256xf32, #tpu.memory_space<vmem>>, vector<1x256xf32>
    %264 = vector.broadcast %263 : vector<1x256xf32> to vector<8x256xf32>
    %265 = arith.mulf %262, %264 : vector<8x256xf32>
    %c0_172 = arith.constant 0 : index
    %c143_173 = arith.constant 143 : index
    %266 = vector.load %arg13[%c0_172, %c143_173] : memref<8x512xf32, #tpu.memory_space<vmem>>, vector<8x256xf32>
    %c0_174 = arith.constant 0 : index
    %c0_175 = arith.constant 0 : index
    %267 = vector.load %arg11[%c0_174, %c0_175] : memref<3x256xf32, #tpu.memory_space<vmem>>, vector<1x256xf32>
    %268 = vector.broadcast %267 : vector<1x256xf32> to vector<8x256xf32>
    %269 = arith.mulf %266, %268 : vector<8x256xf32>
    %c0_176 = arith.constant 0 : index
    %c144_177 = arith.constant 144 : index
    %270 = vector.load %arg13[%c0_176, %c144_177] : memref<8x512xf32, #tpu.memory_space<vmem>>, vector<8x256xf32>
    %c0_178 = arith.constant 0 : index
    %c145_179 = arith.constant 145 : index
    %271 = vector.load %arg13[%c0_178, %c145_179] : memref<8x512xf32, #tpu.memory_space<vmem>>, vector<8x256xf32>
    %c2_180 = arith.constant 2 : index
    %c0_181 = arith.constant 0 : index
    %272 = vector.load %arg11[%c2_180, %c0_181] : memref<3x256xf32, #tpu.memory_space<vmem>>, vector<1x256xf32>
    %273 = vector.broadcast %272 : vector<1x256xf32> to vector<8x256xf32>
    %274 = arith.mulf %271, %273 : vector<8x256xf32>
    %275 = tpu.concatenate %251, %252, %256, %260, %261, %265, %269, %270, %274 in 0 : vector<8x256xf32>, vector<8x256xf32>, vector<8x256xf32>, vector<8x256xf32>, vector<8x256xf32>, vector<8x256xf32>, vector<8x256xf32>, vector<8x256xf32>, vector<8x256xf32> -> vector<72x256xf32>
    %c0_182 = arith.constant 0 : index
    %c0_183 = arith.constant 0 : index
    %276 = vector.load %arg8[%c0_182, %c0_183] : memref<8x72xf32, #tpu.memory_space<vmem>>, vector<8x72xf32>
    %cst_184 = arith.constant dense<0.000000e+00> : vector<8x256xf32>
    %277 = tpu.matmul %276, %275, %cst_184 {dimension_numbers = #tpu.dot_dimension_numbers<[1], [0], [0], [1], [0, 0, 1, 1], [], []>} : vector<8x72xf32>, vector<72x256xf32>, vector<8x256xf32> -> vector<8x256xf32>
    %278 = arith.mulf %277, %277 : vector<8x256xf32>
    %279 = tpu.concatenate %277, %278 in 0 : vector<8x256xf32>, vector<8x256xf32> -> vector<16x256xf32>
    %cst_185 = arith.constant dense<0.000000e+00> : vector<16xf32>
    %280 = vector.multi_reduction <add>, %279, %cst_185 [1] : vector<16x256xf32> to vector<16xf32>
    %281 = vector.shape_cast %280 : vector<16xf32> to vector<16x1xf32>
    %cst_186 = arith.constant 3.906250e-03 : f32
    %282 = vector.broadcast %cst_186 : f32 to vector<16x1xf32>
    %283 = arith.mulf %281, %282 : vector<16x1xf32>
    %284 = vector.extract_strided_slice %283 {offsets = [0, 0], sizes = [8, 1], strides = [1, 1]} : vector<16x1xf32> to vector<8x1xf32>
    %285 = vector.extract_strided_slice %283 {offsets = [8, 0], sizes = [8, 1], strides = [1, 1]} : vector<16x1xf32> to vector<8x1xf32>
    %286 = arith.mulf %284, %284 : vector<8x1xf32>
    %287 = arith.subf %285, %286 : vector<8x1xf32>
    %c0_187 = arith.constant 0 : index
    %c6 = arith.constant 6 : index
    %288 = vector.load %arg9[%c0_187, %c6] : memref<8x7xf32, #tpu.memory_space<vmem>>, vector<8x1xf32>
    %cst_188 = arith.constant 9.99999974E-6 : f32
    %289 = vector.broadcast %cst_188 : f32 to vector<8x1xf32>
    %290 = arith.addf %287, %289 : vector<8x1xf32>
    %291 = math.rsqrt %290 : vector<8x1xf32>
    %292 = arith.mulf %288, %291 : vector<8x1xf32>
    %c0_189 = arith.constant 0 : index
    %c6_190 = arith.constant 6 : index
    %293 = vector.load %arg10[%c0_189, %c6_190] : memref<8x7xf32, #tpu.memory_space<vmem>>, vector<8x1xf32>
    %294 = arith.mulf %284, %292 : vector<8x1xf32>
    %295 = arith.subf %293, %294 : vector<8x1xf32>
    %296 = vector.broadcast %292 : vector<8x1xf32> to vector<8x256xf32>
    %297 = arith.mulf %277, %296 : vector<8x256xf32>
    %298 = vector.broadcast %295 : vector<8x1xf32> to vector<8x256xf32>
    %299 = arith.addf %297, %298 : vector<8x256xf32>
    %300 = arith.addf %299, %190 : vector<8x256xf32>
    %cst_191 = arith.constant 0.00999999977 : f32
    %301 = vector.broadcast %cst_191 : f32 to vector<8x256xf32>
    %302 = arith.mulf %301, %300 : vector<8x256xf32>
    %303 = arith.maximumf %300, %302 : vector<8x256xf32>
    %c0_192 = arith.constant 0 : index
    %c0_193 = arith.constant 0 : index
    %c0_194 = arith.constant 0 : index
    %304 = vector.load %arg12[%c0_192, %c0_193, %c0_194] : memref<1x8x256xf32, #tpu.memory_space<vmem>>, vector<1x8x256xf32>
    %305 = vector.shape_cast %304 : vector<1x8x256xf32> to vector<8x256xf32>
    %306 = vector.shape_cast %303 : vector<8x256xf32> to vector<1x8x256xf32>
    tpu.vector_store %arg12[%c0_192, %c0_193, %c0_194], %306 {strides = array<i32>} : memref<1x8x256xf32, #tpu.memory_space<vmem>>, vector<1x8x256xf32>,
    return
  }
  func.func @transform_0(%arg0: i32) -> (i32, i32, i32) {
    %c0_i32 = arith.constant 0 : i32
    %c0_i32_0 = arith.constant 0 : i32
    %c0_i32_1 = arith.constant 0 : i32
    return %arg0, %c0_i32, %c0_i32_0 : i32, i32, i32
  }
  func.func @transform_1(%arg0: i32) -> (i32, i32) {
    %c0_i32 = arith.constant 0 : i32
    %c0_i32_0 = arith.constant 0 : i32
    %c0_i32_1 = arith.constant 0 : i32
    return %c0_i32, %c0_i32_0 : i32, i32
  }
  func.func @transform_2(%arg0: i32) -> (i32, i32) {
    %c0_i32 = arith.constant 0 : i32
    %c0_i32_0 = arith.constant 0 : i32
    %c0_i32_1 = arith.constant 0 : i32
    return %c0_i32, %c0_i32_0 : i32, i32
  }
  func.func @transform_3(%arg0: i32) -> (i32, i32) {
    %c0_i32 = arith.constant 0 : i32
    %c0_i32_0 = arith.constant 0 : i32
    %c0_i32_1 = arith.constant 0 : i32
    return %c0_i32, %c0_i32_0 : i32, i32
  }
  func.func @transform_4(%arg0: i32) -> (i32, i32) {
    %c0_i32 = arith.constant 0 : i32
    %c0_i32_0 = arith.constant 0 : i32
    %c0_i32_1 = arith.constant 0 : i32
    return %c0_i32, %c0_i32_0 : i32, i32
  }
  func.func @transform_5(%arg0: i32) -> (i32, i32) {
    %c0_i32 = arith.constant 0 : i32
    %c0_i32_0 = arith.constant 0 : i32
    %c0_i32_1 = arith.constant 0 : i32
    return %c0_i32, %c0_i32_0 : i32, i32
  }
  func.func @transform_6(%arg0: i32) -> (i32, i32) {
    %c0_i32 = arith.constant 0 : i32
    %c0_i32_0 = arith.constant 0 : i32
    %c0_i32_1 = arith.constant 0 : i32
    return %c0_i32, %c0_i32_0 : i32, i32
  }
  func.func @transform_7(%arg0: i32) -> (i32, i32) {
    %c0_i32 = arith.constant 0 : i32
    %c0_i32_0 = arith.constant 0 : i32
    %c0_i32_1 = arith.constant 0 : i32
    return %c0_i32, %c0_i32_0 : i32, i32
  }
  func.func @transform_8(%arg0: i32) -> (i32, i32) {
    %c0_i32 = arith.constant 0 : i32
    %c0_i32_0 = arith.constant 0 : i32
    %c0_i32_1 = arith.constant 0 : i32
    return %c0_i32, %c0_i32_0 : i32, i32
  }
  func.func @transform_9(%arg0: i32) -> (i32, i32) {
    %c0_i32 = arith.constant 0 : i32
    %c0_i32_0 = arith.constant 0 : i32
    %c0_i32_1 = arith.constant 0 : i32
    return %c0_i32, %c0_i32_0 : i32, i32
  }
  func.func @transform_10(%arg0: i32) -> (i32, i32) {
    %c0_i32 = arith.constant 0 : i32
    %c0_i32_0 = arith.constant 0 : i32
    %c0_i32_1 = arith.constant 0 : i32
    return %c0_i32, %c0_i32_0 : i32, i32
  }
  func.func @transform_11(%arg0: i32) -> (i32, i32, i32) {
    %c0_i32 = arith.constant 0 : i32
    %c0_i32_0 = arith.constant 0 : i32
    %c0_i32_1 = arith.constant 0 : i32
    return %arg0, %c0_i32, %c0_i32_0 : i32, i32, i32
  }
}

</mosaic_0001>

<bundles_post_ra>
// kernel: stacked_residual_blocks_forward.1
= control target key start
LH: loop header
LB: loop body
LE: loop exit
PB: predicated region body
PF: predicated region fallthrough
CT: control target
= control target key end

     0   :  { %s2926_s17 = smov 0   ;;  %s3491_s0 = inlined_call_operand.vmem [shape: f32[2,8,256], index: 0, kind: input, shape index: {}]   ;;  %s3492_s1 = inlined_call_operand.vmem [shape: f32[8,8], index: 1, kind: input, shape index: {}]   ;;  %s3493_s2 = inlined_call_operand.vmem [shape: f32[8,72], index: 2, kind: input, shape index: {}]   ;;  %s3494_s3 = inlined_call_operand.vmem [shape: f32[8,72], index: 3, kind: input, shape index: {}]   ;;  %s3495_s4 = inlined_call_operand.vmem [shape: f32[8,8], index: 4, kind: input, shape index: {}]   ;;  %s3496_s5 = inlined_call_operand.vmem [shape: f32[8,8], index: 5, kind: input, shape index: {}]   ;;  %s3497_s6 = inlined_call_operand.vmem [shape: f32[8,72], index: 6, kind: input, shape index: {}]   ;;  %s3498_s7 = inlined_call_operand.vmem [shape: f32[8,72], index: 7, kind: input, shape index: {}]   ;;  %s3499_s8 = inlined_call_operand.vmem [shape: f32[8,7], index: 8, kind: input, shape index: {}]   ;;  %s3500_s9 = inlined_call_operand.vmem [shape: f32[8,7], index: 9, kind: input, shape index: {}]   ;;  %s3501_s10 = inlined_call_operand.vmem [shape: f32[3,256], index: 10, kind: input, shape index: {}]   ;;  %s3502_s11 = inlined_call_operand.vmem [shape: f32[2,8,256], index: 11, kind: output, shape index: {}]  }
   0x1 LB: > { %s2313_s18 = sadd.s32 4294967295, %s2844_s17   ;;  %p2317_p0 = scmp.ge.s32.totalorder %s2844_s17, 1  ;;  %s2844_s17 = sphi %s2926_s17, %s21_s17  }
   0x2   : > { %p337_p1 = scmp.lt.s32.totalorder %s2844_s17, 3 }
   0x4   : > { %p338_p2 = pnand %p2317_p0, %p337_p1 }
   0x5   : > { %v507_v0 = vlaneseq (!%p338_p2)  ;;  %v2846_v1 = vmov (!%p338_p2), 0.0   ;;  %v2323_v3 = vld [vmem:[%s3501_s10 + $0x2] ss:$4 sm:$0x3] (!%p338_p2)  ;;  %p377_p3 = scmp.lt.s32.totalorder (!%p338_p2), %s2313_s18, 1  ;;  %s2847_s24 = smov (!%p338_p2), 113  }
   0x6   : > { %341 = sbr.rel (%p338_p2) target bundleno = 3327 (0xcff), region = 64  ;;  %851 = vmatprep.mubr.f32.mxu1 (!%p338_p2), %v2846_v1  ;;  %460 = vmatprep.mubr.f32.mxu0 (!%p338_p2), %v2846_v1  ;;  %v505_v4 = vld [vmem:[%s3501_s10] ss:$4 sm:$0x3] (!%p338_p2)  ;;  %s2848_s25 = smov (!%p338_p2), 127   ;;  %vm554_vm0 = vcmask (!%p338_p2), 1039360  }
   0x7   : > { %v508_v2 = vshrl.u32 (!%p338_p2), %v507_v0, 7  ;;  %s2849_s29 = smov (!%p338_p2), 1   ;;  %s2850_s30 = smov (!%p338_p2), 15   ;;  %vm542_vm1 = vcmask (!%p338_p2), 924672   ;;  %vm569_vm2 = vcmask (!%p338_p2), 7168   ;;  %vm581_vm3 = vcmask (!%p338_p2), 121856  }
   0x8   : > { %s2851_s12 = smov (!%p338_p2), 17   ;;  %s2852_s13 = smov (!%p338_p2), 111   ;;  %vm593_vm4 = vcmask (!%p338_p2), 138240   ;;  %vm519_vm5 = vcmask (!%p338_p2), 908288   ;;  %vm633_vm6 = vcmask (!%p338_p2), 916480   ;;  %vm621_vm7 = vcmask (!%p338_p2), 1031168  }
   0x9   : > { %v2942_v5 = vsub.s32 (!%p338_p2), 0, %v508_v2  ;;  %v2944_v6 = vsub.s32 (!%p338_p2), 1, %v508_v2  ;;  %s2853_s14 = smov (!%p338_p2), 112   ;;  %s2854_s15 = smov (!%p338_p2), 126   ;;  %vm674_vm8 = vcmask (!%p338_p2), 777216   ;;  %vm650_vm9 = vcmask (!%p338_p2), 900096  }
   0xa   : > { %s2855_s16 = smov (!%p338_p2), 95   ;;  %s2856_s19 = smov (!%p338_p2), 110   ;;  %vm662_vm10 = vcmask (!%p338_p2), 785408   ;;  %vm686_vm11 = vcmask (!%p338_p2), 769024   ;;  %vm783_vm12 = vcmask (!%p338_p2), 588800   ;;  %vm392_vm13 = vcmask (!%p338_p2), 64512  }
   0xb   : > { %v533_v7 = vrot.slane (!%p338_p2), %v2323_v3, %v2942_v5  ;;  %v510_v8 = vrot.slane (!%p338_p2), %v505_v4, %v2942_v5  ;;  %v537_v9 = vrot.slane (!%p338_p2), %v2323_v3, %v2944_v6  ;;  %v514_v10 = vrot.slane (!%p338_p2), %v505_v4, %v2944_v6  ;;  %s2857_s20 = smov (!%p338_p2), 96   ;;  %s3504_s21 = smov (!%p338_p2), 94  }
   0xc   : > { %s3506_s22 = smov (!%p338_p2), 94  }
   0xd   : > { %s3509_s18 = smov (!%p377_p3, %s2313_s18), 1  ;;  %538 = vrot.lane.b32.xlu0 %v533_v7, %s2847_s24  ;;  %550 = vrot.lane.b32.xlu1 %v510_v8, %s2848_s25 }
   0xe   : > { %s3503_s23 = sshll.u32 %s3509_s18, 4 }
   0xf   : > { %s381_s28 = scalar_lea.vmem %s3491_s0, %s3503_s23 }
  0x10   : > { %v2960_v11 = vld [vmem:[%s381_s28 + $0x8] sm:$0xff]  ;;  %v2962_v12 = vld [vmem:[%s381_s28] sm:$0xff] }
  0x11   : > { %396 = vmatprep.subr.mxu0 %v2960_v11  ;;  %540 = vrot.lane.b32.xlu0 %v537_v9, %s2847_s24  ;;  %v2429_v13 = vpack.i.bf16 %v2960_v11, %v2962_v12 }
  0x12   : > { %397 = vmatpush1.msra.mxu0 %v2962_v12  ;;  %552 = vrot.lane.b32.xlu1 %v514_v10, %s2848_s25 }
  0x15   : > { %565 = vrot.lane.b32.xlu0 %v533_v7, %s2849_s29 }
  0x16   : > { %567 = vrot.lane.b32.xlu1 %v537_v9, %s2849_s29 }
  0x19   : > { %577 = vrot.lane.b32.xlu0 %v510_v8, %s2850_s30 }
  0x1a   : > { %579 = vrot.lane.b32.xlu1 %v514_v10, %s2850_s30 }
  0x1d   : > { %589 = vrot.lane.b32.xlu0 %v533_v7, %s2851_s12 }
  0x1e   : > { %591 = vrot.lane.b32.xlu1 %v537_v9, %s2851_s12 }
  0x21   : > { %515 = vrot.lane.b32.xlu0 %v510_v8, %s2852_s13 }
  0x22   : > { %517 = vrot.lane.b32.xlu1 %v514_v10, %s2852_s13 }
  0x25   : > { %2430 = vrot.lane.b32.xlu0 %v2429_v13, %s2848_s25 }
  0x26   : > { %604 = vrot.lane.b32.xlu1 %v2846_v1, %s2848_s25 }
  0x29   : > { %2435 = vrot.lane.b32.xlu0 %v2429_v13, %s2852_s13 }
  0x7f   : > { %v539_v14 = vpop.permute.xlu0 %538  ;;  %v551_v15 = vpop.permute.xlu1 %550 }
  0x80   : > { %v547_v16 = vmul.f32 0.0, %v539_v14  ;;  %v559_v17 = vmul.f32 0.0, %v551_v15 }
  0x82   : > { %627 = vrot.lane.b32.xlu1 %v559_v17, %s2853_s14  ;;  %615 = vrot.lane.b32.xlu0 %v547_v16, %s2854_s15 }
  0x83   : > { %v541_v18 = vpop.permute.xlu0 %540 }
  0x84   : > { %v553_v19 = vpop.permute.xlu1 %552  ;;  %v543_v22 = vsel %vm542_vm1, %v539_v14, %v541_v18  ;;  %v549_v24 = vmul.f32 %v541_v18, %v2960_v11 }
  0x85   : > { %v555_v20 = vsel %vm554_vm0, %v551_v15, %v553_v19  ;;  %v561_v21 = vmul.f32 %v553_v19, %v2960_v11  ;;  %v548_v28 = vmul.f32 %v543_v22, %v2962_v12 }
  0x86   : > { %v560_v23 = vmul.f32 %v555_v20, %v2962_v12  ;;  %2445 = vrot.lane.b32.xlu1 %v2429_v13, %s2855_s16 }
  0x87   : > { %v566_v25 = vpop.permute.xlu0 %565  ;;  %v2439_v38 = vpack.i.bf16 %v549_v24, %v548_v28 }
  0x88   : > { %v568_v26 = vpop.permute.xlu1 %567  ;;  %v2449_v27 = vpack.i.bf16 %v561_v21, %v560_v23  ;;  %v574_v29 = vmul.f32 %v566_v25, %v2962_v12 }
  0x89   : > { %v570_v30 = vsel %vm569_vm2, %v566_v25, %v568_v26  ;;  %v576_v31 = vmul.f32 0.0, %v568_v26 }
  0x8a   : > { %v575_v32 = vmul.f32 %v570_v30, %v2960_v11  ;;  %2450 = vrot.lane.b32.xlu1 %v2449_v27, %s2853_s14 }
  0x8b   : > { %648 = vrot.lane.b32.xlu0 %v576_v31, %s2856_s19  ;;  %v578_v33 = vpop.permute.xlu0 %577 }
  0x8c   : > { %v580_v34 = vpop.permute.xlu1 %579  ;;  %v2454_v35 = vpack.i.bf16 %v575_v32, %v574_v29  ;;  %v586_v36 = vmul.f32 %v578_v33, %v2962_v12 }
  0x8d   : > { %v582_v37 = vsel %vm581_vm3, %v578_v33, %v580_v34  ;;  %v588_v40 = vmul.f32 0.0, %v580_v34 }
  0x8e   : > { %v587_v39 = vmul.f32 %v582_v37, %v2960_v11  ;;  %2455 = vrot.lane.b32.xlu1 %v2454_v35, %s2856_s19 }
  0x8f   : > { %2440 = vrot.lane.b32.xlu0 %v2439_v38, %s2854_s15  ;;  %v590_v42 = vpop.permute.xlu0 %589 }
  0x90   : > { %v2459_v41 = vpack.i.bf16 %v587_v39, %v586_v36  ;;  %v592_v43 = vpop.permute.xlu1 %591  ;;  %v598_v44 = vmul.f32 %v590_v42, %v2962_v12 }
  0x91   : > { %v594_v45 = vsel %vm593_vm4, %v590_v42, %v592_v43  ;;  %v600_v48 = vmul.f32 0.0, %v592_v43 }
  0x92   : > { %2460 = vrot.lane.b32.xlu1 %v2459_v41, %s2857_s20  ;;  %v599_v49 = vmul.f32 %v594_v45, %v2960_v11 }
  0x93   : > { %660 = vrot.lane.b32.xlu0 %v588_v40, %s2857_s20  ;;  %v516_v46 = vpop.permute.xlu0 %515 }
  0x94   : > { %v518_v47 = vpop.permute.xlu1 %517  ;;  %v524_v50 = vmul.f32 0.0, %v516_v46 }
  0x95   : > { %v520_v57 = vsel %vm519_vm5, %v516_v46, %v518_v47  ;;  %v526_v0 = vmul.f32 %v518_v47, %v2960_v11 }
  0x96   : > { %680 = vrot.lane.b32.xlu1 %v598_v44, %s3504_s21  ;;  %v525_v63 = vmul.f32 %v520_v57, %v2962_v12 }
  0x97   : > { %672 = vrot.lane.b32.xlu0 %v2846_v1, %s2855_s16  ;;  %v2431_v51 = vpop.permute.xlu0 %2430 }
  0x98   : > { %v605_v52 = vpop.permute.xlu1 %604  ;;  %v2433_v53 = vunpack.i.h.bf16 %v2431_v51  ;;  %v2432_v54 = vunpack.i.l.bf16 %v2431_v51  ;;  %v2479_v4 = vpack.i.bf16 %v526_v0, %v525_v63 }
  0x9a   : > { %684 = vrot.lane.b32.xlu1 %v600_v48, %s3504_s21  ;;  %v610_v55 = vsel %vm554_vm0, %v605_v52, %v2432_v54  ;;  %v611_v56 = vsel %vm554_vm0, %v2432_v54, %v2433_v53 }
  0x9b   : > { %682 = vrot.lane.b32.xlu0 %v599_v49, %s3504_s21  ;;  %v2469_v58 = vpack.i.bf16 %v610_v55, %v524_v50  ;;  %v2436_v59 = vpop.permute.xlu0 %2435  ;;  %v2464_v60 = vpack.i.bf16 %v2433_v53, %v611_v56 }
  0x9c   : > { %v2438_v61 = vunpack.i.h.bf16 %v2436_v59  ;;  %v2437_v62 = vunpack.i.l.bf16 %v2436_v59 }
  0x9e   : > { %v640_v2 = vsel %vm519_vm5, %v2437_v62, %v2438_v61  ;;  %2465 = vrot.lane.b32.xlu1 %v2464_v60, %s2851_s12 }
  0x9f   : > { %2470 = vrot.lane.b32.xlu0 %v2469_v58, %s2851_s12  ;;  %v2474_v3 = vpack.i.bf16 %v2438_v61, %v640_v2 }
  0xa3   : > { %2475 = vrot.lane.b32.xlu0 %v2474_v3, %s2851_s12 }
  0xa7   : > { %2480 = vrot.lane.b32.xlu0 %v2479_v4, %s2851_s12 }
  0xf4   : > { %v628_v7 = vpop.permute.xlu1 %627  ;;  %v616_v8 = vpop.permute.xlu0 %615 }
  0xf8   : > { %v2446_v9 = vpop.permute.xlu1 %2445 }
  0xf9   : > { %v2448_v23 = vunpack.i.h.bf16 %v2446_v9  ;;  %v2447_v24 = vunpack.i.l.bf16 %v2446_v9 }
  0xfb   : > { %v675_v31 = vsel %vm674_vm8, %v2447_v24, %v2448_v23 }
  0xfc   : > { %v2451_v13 = vpop.permute.xlu1 %2450 }
  0xfd   : > { %v649_v10 = vpop.permute.xlu0 %648  ;;  %v2453_v12 = vunpack.i.h.bf16 %v2451_v13  ;;  %v2452_v11 = vunpack.i.l.bf16 %v2451_v13 }
  0xff   : > { %v635_v14 = vsel %vm633_vm6, %v2452_v11, %v2453_v12  ;;  %v634_v30 = vsel %vm633_vm6, %v628_v7, %v2452_v11 }
 0x100   : > { %v2456_v15 = vpop.permute.xlu1 %2455  ;;  %v2489_v17 = vpack.i.bf16 %v2453_v12, %v635_v14 }
 0x101   : > { %v2441_v16 = vpop.permute.xlu0 %2440  ;;  %v2457_v18 = vunpack.i.l.bf16 %v2456_v15  ;;  %v2458_v28 = vunpack.i.h.bf16 %v2456_v15 }
 0x102   : > { %v2443_v19 = vunpack.i.h.bf16 %v2441_v16  ;;  %v2442_v20 = vunpack.i.l.bf16 %v2441_v16  ;;  %2490 = vrot.lane.b32.xlu0 %v2489_v17, %s2851_s12 }
 0x103   : > { %v2494_v22 = vpack.i.bf16 %v2457_v18, %v2437_v62  ;;  %v651_v37 = vsel %vm650_vm9, %v2457_v18, %v2458_v28  ;;  %v652_v38 = vsel %vm650_vm9, %v2458_v28, %v649_v10 }
 0x104   : > { %v623_v21 = vsel %vm621_vm7, %v2442_v20, %v2443_v19  ;;  %v2461_v25 = vpop.permute.xlu1 %2460  ;;  %v622_v29 = vsel %vm621_vm7, %v616_v8, %v2442_v20  ;;  %v2509_v41 = vpack.i.bf16 %v652_v38, %v651_v37 }
 0x105   : > { %v661_v26 = vpop.permute.xlu0 %660  ;;  %v2484_v27 = vpack.i.bf16 %v2443_v19, %v623_v21  ;;  %v2504_v33 = vpack.i.bf16 %v634_v30, %v622_v29  ;;  %v2463_v35 = vunpack.i.h.bf16 %v2461_v25  ;;  %v2462_v40 = vunpack.i.l.bf16 %v2461_v25 }
 0x106   : > { %2495 = vrot.lane.b32.xlu0 %v2494_v22, %s2851_s12 }
 0x107   : > { %2485 = vrot.lane.b32.xlu1 %v2484_v27, %s2851_s12  ;;  %v663_v43 = vsel %vm662_vm10, %v2462_v40, %v2463_v35  ;;  %v664_v44 = vsel %vm662_vm10, %v2463_v35, %v661_v26  ;;  %v2519_v50 = vpack.i.bf16 %v2447_v24, %v2462_v40 }
 0x108   : > { %v681_v34 = vpop.permute.xlu1 %680  ;;  %v2514_v47 = vpack.i.bf16 %v664_v44, %v663_v43 }
 0x109   : > { %v673_v32 = vpop.permute.xlu0 %672 }
 0x10a   : > { %v676_v36 = vsel %vm674_vm8, %v2448_v23, %v673_v32 }
 0x10b   : > { %v2499_v39 = vpack.i.bf16 %v676_v36, %v675_v31  ;;  %2505 = vrot.lane.b32.xlu1 %v2504_v33, %s2851_s12 }
 0x10c   : > { %v685_v46 = vpop.permute.xlu1 %684 }
 0x10d   : > { %2500 = vrot.lane.b32.xlu0 %v2499_v39, %s2851_s12  ;;  %v683_v42 = vpop.permute.xlu0 %682 }
 0x10e   : > { %v687_v45 = vsel %vm686_vm11, %v681_v34, %v683_v42  ;;  %v688_v55 = vsel %vm686_vm11, %v683_v42, %v685_v46 }
 0x10f   : > { %2510 = vrot.lane.b32.xlu1 %v2509_v41, %s2851_s12 }
 0x110   : > { %v2466_v49 = vpop.permute.xlu1 %2465 }
 0x111   : > { %743 = vrot.lane.b32.xlu0 %v687_v45, %s2851_s12  ;;  %v2471_v48 = vpop.permute.xlu0 %2470  ;;  %v2468_v53 = vunpack.i.h.bf16 %v2466_v49  ;;  %v2467_v54 = vunpack.i.l.bf16 %v2466_v49 }
 0x112   : > { %v2473_v52 = vunpack.i.h.bf16 %v2471_v48  ;;  %v2472_v56 = vunpack.i.l.bf16 %v2471_v48 }
 0x113   : > { %2515 = vrot.lane.b32.xlu1 %v2514_v47, %s2851_s12  ;;  %v750_v60 = vsel %vm593_vm4, %v2467_v54, %v2468_v53  ;;  %v689_v53 = vld [vmem:[%s3493_s2] sm:$0xff] }
 0x114   : > { %v749_v61 = vsel %vm593_vm4, %v2473_v52, %v2467_v54 }
 0x115   : > { %741 = vrot.lane.b32.xlu0 %v681_v34, %s2851_s12  ;;  %v2476_v51 = vpop.permute.xlu0 %2475 }
 0x116   : > { %v2478_v18 = vunpack.i.h.bf16 %v2476_v51  ;;  %v2477_v19 = vunpack.i.l.bf16 %v2476_v51 }
 0x117   : > { %2520 = vrot.lane.b32.xlu1 %v2519_v50, %s2851_s12 }
 0x118   : > { %v756_v29 = vsel %vm593_vm4, %v2477_v19, %v2478_v18 }
 0x119   : > { %v2481_v57 = vpop.permute.xlu0 %2480 }
 0x11a   : > { %v2483_v58 = vunpack.i.h.bf16 %v2481_v57  ;;  %v2482_v59 = vunpack.i.l.bf16 %v2481_v57 }
 0x11b   : > { %745 = vrot.lane.b32.xlu1 %v688_v55, %s2851_s12 }
 0x11c   : > { %v748_v62 = vsel %vm593_vm4, %v2482_v59, %v2483_v58  ;;  %v747_v63 = vsel %vm593_vm4, %v2472_v56, %v2482_v59 }
 0x11d   : > { %v2337_v0 = vpack.c.bf16 %v750_v60, %v748_v62  ;;  %v2339_v2 = vpack.c.bf16 %v749_v61, %v747_v63  ;;  %v2325_v61 = vld [vmem:[%s3501_s10 + $0x2] ss:$4 sm:$0x3]  ;;  %v2859_v62 = vmov 1  }
 0x11e   : > { %2524 = vset.pattern.permute.xlu0 %v2859_v62  ;;  %v926_v63 = vrot.slane %v2325_v61, %v2942_v5  ;;  %2525 = vset.pattern.permute.xlu1 %v2859_v62  ;;  %v930_v18 = vrot.slane %v2325_v61, %v2944_v6 }
 0x11f   : > { %2338 = vmatprep.subr.bf16.mxu1 %v2337_v0 }
 0x120   : > { %2340 = vmatpush1.bf16.msra.mxu1 %v2339_v2 }
 0x174   : > { %v2491_v3 = vpop.permute.xlu0 %2490 }
 0x175   : > { %v2493_v4 = vunpack.i.h.bf16 %v2491_v3  ;;  %v2492_v7 = vunpack.i.l.bf16 %v2491_v3 }
 0x177   : > { %v754_v11 = vsel %vm593_vm4, %v2492_v7, %v2493_v4 }
 0x178   : > { %v2496_v13 = vpop.permute.xlu0 %2495 }
 0x179   : > { %v2486_v8 = vpop.permute.xlu1 %2485  ;;  %v2497_v20 = vunpack.i.l.bf16 %v2496_v13  ;;  %v2498_v26 = vunpack.i.h.bf16 %v2496_v13 }
 0x17a   : > { %v2488_v9 = vunpack.i.h.bf16 %v2486_v8  ;;  %v2487_v10 = vunpack.i.l.bf16 %v2486_v8 }
 0x17b   : > { %v755_v30 = vsel %vm593_vm4, %v2497_v20, %v2477_v19 }
 0x17c   : > { %v752_v12 = vsel %vm593_vm4, %v2487_v10, %v2488_v9 }
 0x17d   : > { %v2506_v14 = vpop.permute.xlu1 %2505  ;;  %v2341_v15 = vpack.c.bf16 %v754_v11, %v752_v12  ;;  %v900_v12 = vld [vmem:[%s3501_s10] ss:$4 sm:$0x3] }
 0x17e   : > { %v2508_v16 = vunpack.i.h.bf16 %v2506_v14  ;;  %v2507_v17 = vunpack.i.l.bf16 %v2506_v14  ;;  %v3084_v14 = vld [vmem:[%s3500_s9] sm:$0xff]  ;;  %v905_v19 = vrot.slane %v900_v12, %v2942_v5 }
 0x17f   : > { %2342 = vmatprep.subr.bf16.mxu1 %v2341_v15  ;;  %v2501_v23 = vpop.permute.xlu0 %2500 }
 0x180   : > { %v751_v21 = vsel %vm593_vm4, %v2507_v17, %v2487_v10  ;;  %v753_v22 = vsel %vm593_vm4, %v2508_v16, %v2492_v7  ;;  %v2503_v31 = vunpack.i.h.bf16 %v2501_v23  ;;  %v2502_v32 = vunpack.i.l.bf16 %v2501_v23  ;;  %v3075_v10 = vld [vmem:[%s3499_s8] sm:$0xff] }
 0x181   : > { %v2511_v24 = vpop.permute.xlu1 %2510  ;;  %v2343_v25 = vpack.c.bf16 %v753_v22, %v751_v21  ;;  %v909_v16 = vrot.slane %v900_v12, %v2944_v6 }
 0x182   : > { %v2513_v27 = vunpack.i.h.bf16 %v2511_v24  ;;  %v2512_v28 = vunpack.i.l.bf16 %v2511_v24  ;;  %v762_v41 = vsel %vm593_vm4, %v2502_v32, %v2503_v31 }
 0x183   : > { %2344 = vmatpush1.bf16.msra.mxu1 %v2343_v25  ;;  %v744_v42 = vpop.permute.xlu0 %743 }
 0x184   : > { %v758_v33 = vsel %vm593_vm4, %v2512_v28, %v2513_v27  ;;  %v757_v34 = vsel %vm593_vm4, %v2498_v26, %v2512_v28 }
 0x185   : > { %v2516_v35 = vpop.permute.xlu1 %2515  ;;  %v2345_v36 = vpack.c.bf16 %v758_v33, %v756_v29  ;;  %v2347_v37 = vpack.c.bf16 %v757_v34, %v755_v30 }
 0x186   : > { %v2518_v38 = vunpack.i.h.bf16 %v2516_v35  ;;  %v2517_v39 = vunpack.i.l.bf16 %v2516_v35 }
 0x187   : > { %2346 = vmatprep.subr.bf16.mxu1 %v2345_v36  ;;  %v742_v52 = vpop.permute.xlu0 %741 }
 0x188   : > { %2348 = vmatpush1.bf16.msra.mxu1 %v2347_v37  ;;  %v760_v40 = vsel %vm593_vm4, %v2517_v39, %v2518_v38  ;;  %v763_v54 = vsel %vm593_vm4, %v742_v52, %v744_v42 }
 0x189   : > { %v2521_v43 = vpop.permute.xlu1 %2520  ;;  %v2349_v44 = vpack.c.bf16 %v762_v41, %v760_v40 }
 0x18a   : > { %v2523_v45 = vunpack.i.h.bf16 %v2521_v43  ;;  %v2522_v46 = vunpack.i.l.bf16 %v2521_v43 }
 0x18b   : > { %2350 = vmatprep.subr.bf16.mxu1 %v2349_v44 }
 0x18c   : > { %v759_v47 = vsel %vm593_vm4, %v2522_v46, %v2517_v39  ;;  %v761_v48 = vsel %vm593_vm4, %v2523_v45, %v2502_v32 }
 0x18d   : > { %v746_v49 = vpop.permute.xlu1 %745  ;;  %v2351_v50 = vpack.c.bf16 %v761_v48, %v759_v47 }
 0x18e   : > { %v764_v51 = vsel %vm593_vm4, %v744_v42, %v746_v49 }
 0x18f   : > { %2352 = vmatpush1.bf16.msra.mxu1 %v2351_v50  ;;  %v391_v50 = vld [vmem:[%s3492_s1] sm:$0xff] }
 0x190   : > { %803 = vmatprep.subr.mxu1 %v764_v51  ;;  %2322 = vmatmul.mubr.msk.f32.vlgmr.msra.gmra.mrb[0].mxu0 %vm392_vm13, %v391_v50 }
 0x191   : > { %1232 = vmatprep.mubr.f32.mxu0 %v2846_v1 }
 0x193   : > { %804 = vmatpush1.msra.mxu1 %v763_v54 }
 0x194   : > { %2324 = vmatmul.mubr.msk.f32.vlgmr.msra.gmra.mrb[0].mxu1 %vm783_vm12, %v689_v53 }
 0x195   : > { %1346 = vmatprep.mubr.f32.mxu1 %v2846_v1 }
 0x267   : > { %v853_v55 = vpop.f32.mrb[0].mxu1 }
 0x268   : > { %v855_v56 = vpop.f32.mrb[1].mxu1  ;;  %v858_v57 = vmul.f32 %v853_v55, %v853_v55 }
 0x269   : > { %v860_v58 = vadd.f32 %v855_v56, %v853_v55  ;;  %v859_v59 = vmul.f32 %v855_v56, %v855_v56 }
 0x26b   : > { %861 = vadd.xlane.f32.xlu1 %v860_v58  ;;  %v863_v60 = vadd.f32 %v859_v59, %v858_v57 }
 0x26d   : > { %864 = vadd.xlane.f32.xlu0 %v863_v60 }
 0x27c   : > { %931 = vrot.lane.b32.xlu1 %v926_v63, %s2847_s24 }
 0x2f8   : > { %v862_v0 = vpop.xlane.xlu1 %861 }
 0x2f9   : > { %v866_v2 = vmul.f32 0.00390625, %v862_v0 }
 0x2fa   : > { %v865_v3 = vpop.xlane.xlu0 %864 }
 0x2fb   : > { %v868_v4 = vmul.f32 %v866_v2, %v866_v2  ;;  %v867_v7 = vmul.f32 0.00390625, %v865_v3 }
 0x2fc   : > { %v932_v20 = vpop.permute.xlu1 %931 }
 0x2fd   : > { %v869_v8 = vsub.f32 %v867_v7, %v868_v4  ;;  %v939_v21 = vmul.f32 0.0, %v932_v20 }
 0x2ff   : > { %v871_v9 = vadd.f32 1e-05, %v869_v8 }
 0x301   : > { %2822 = vrsqrt.f32 %v871_v9 }
 0x30b   : > { %v2823_v13 = vpop.eup %2822 }
 0x30c   : > { %v873_v11 = vmul.f32 %v2823_v13, %v3075_v10 }
 0x30e   : > { %879 = vperm.xlu0 %2524, %v873_v11   ;;  %v875_v15 = vmul.f32 %v873_v11, %v866_v2 }
 0x310   : > { %v876_v17 = vsub.f32 %v3084_v14, %v875_v15 }
 0x312   : > { %886 = vperm.xlu1 %2525, %v876_v17   ;;  %969 = vrot.lane.b32.xlu0 %v909_v16, %s2850_s30 }
 0x316   : > { %980 = vrot.lane.b32.xlu0 %v930_v18, %s2851_s12  ;;  %933 = vrot.lane.b32.xlu1 %v930_v18, %s2847_s24 }
 0x31a   : > { %912 = vrot.lane.b32.xlu0 %v909_v16, %s2852_s13  ;;  %942 = vrot.lane.b32.xlu1 %v905_v19, %s2848_s25 }
 0x31e   : > { %944 = vrot.lane.b32.xlu1 %v909_v16, %s2848_s25  ;;  %992 = vrot.lane.b32.xlu0 %v2846_v1, %s2848_s25 }
 0x322   : > { %956 = vrot.lane.b32.xlu1 %v926_v63, %s2849_s29 }
 0x326   : > { %958 = vrot.lane.b32.xlu1 %v930_v18, %s2849_s29 }
 0x32a   : > { %967 = vrot.lane.b32.xlu1 %v905_v19, %s2850_s30 }
 0x32e   : > { %978 = vrot.lane.b32.xlu1 %v926_v63, %s2851_s12 }
 0x332   : > { %910 = vrot.lane.b32.xlu1 %v905_v19, %s2852_s13 }
 0x336   : > { %1003 = vrot.lane.b32.xlu1 %v939_v21, %s2854_s15 }
 0x38d   : > { %v880_v22 = vpop.permute.xlu0 %879 }
 0x38e   : > { %v882_v23 = vmul.f32 %v880_v22, %v853_v55  ;;  %v883_v24 = vmul.f32 %v880_v22, %v855_v56 }
 0x391   : > { %v887_v25 = vpop.permute.xlu1 %886  ;;  %v970_v46 = vpop.permute.xlu0 %969 }
 0x392   : > { %v889_v26 = vadd.f32 %v887_v25, %v882_v23  ;;  %v890_v27 = vadd.f32 %v887_v25, %v883_v24  ;;  %v977_v7 = vmul.f32 0.0, %v970_v46 }
 0x394   : > { %v891_v28 = vmul.f32 0.01, %v889_v26  ;;  %v892_v29 = vmul.f32 0.01, %v890_v27 }
 0x395   : > { %v934_v30 = vpop.permute.xlu1 %933  ;;  %v981_v55 = vpop.permute.xlu0 %980 }
 0x396   : > { %v893_v31 = vmax.f32 %v889_v26, %v891_v28  ;;  %v894_v32 = vmax.f32 %v890_v27, %v892_v29  ;;  %v935_v33 = vsel %vm542_vm1, %v932_v20, %v934_v30  ;;  %v988_v2 = vmul.f32 0.0, %v981_v55 }
 0x398   : > { %v940_v34 = vmul.f32 %v935_v33, %v893_v31  ;;  %v941_v35 = vmul.f32 %v934_v30, %v894_v32  ;;  %v2541_v36 = vpack.i.bf16 %v894_v32, %v893_v31 }
 0x399   : > { %v943_v37 = vpop.permute.xlu1 %942  ;;  %v913_v61 = vpop.permute.xlu0 %912 }
 0x39a   : > { %v950_v38 = vmul.f32 0.0, %v943_v37  ;;  %v2536_v39 = vpack.i.bf16 %v941_v35, %v940_v34  ;;  %v920_v3 = vmul.f32 %v913_v61, %v894_v32 }
 0x39c   : > { %1014 = vrot.lane.b32.xlu0 %v950_v38, %s2853_s14 }
 0x39d   : > { %v945_v40 = vpop.permute.xlu1 %944  ;;  %v993_v12 = vpop.permute.xlu0 %992 }
 0x39e   : > { %v946_v41 = vsel %vm554_vm0, %v943_v37, %v945_v40  ;;  %v952_v42 = vmul.f32 %v945_v40, %v894_v32 }
 0x39f   : > { %v951_v43 = vmul.f32 %v946_v41, %v893_v31 }
 0x3a0   : > { %2542 = vrot.lane.b32.xlu0 %v2541_v36, %s2855_s16 }
 0x3a1   : > { %v957_v44 = vpop.permute.xlu1 %956  ;;  %v2546_v45 = vpack.i.bf16 %v952_v42, %v951_v43 }
 0x3a2   : > { %v964_v51 = vmul.f32 %v957_v44, %v893_v31 }
 0x3a4   : > { %2547 = vrot.lane.b32.xlu0 %v2546_v45, %s2853_s14 }
 0x3a5   : > { %v959_v47 = vpop.permute.xlu1 %958 }
 0x3a6   : > { %v960_v48 = vsel %vm569_vm2, %v957_v44, %v959_v47  ;;  %v966_v49 = vmul.f32 0.0, %v959_v47 }
 0x3a7   : > { %v965_v52 = vmul.f32 %v960_v48, %v894_v32 }
 0x3a8   : > { %1034 = vrot.lane.b32.xlu1 %v966_v49, %s2856_s19 }
 0x3a9   : > { %v968_v53 = vpop.permute.xlu1 %967  ;;  %v2551_v54 = vpack.i.bf16 %v965_v52, %v964_v51 }
 0x3aa   : > { %v971_v56 = vsel %vm581_vm3, %v968_v53, %v970_v46  ;;  %v975_v57 = vmul.f32 %v968_v53, %v893_v31 }
 0x3ab   : > { %v976_v58 = vmul.f32 %v971_v56, %v894_v32  ;;  %2552 = vrot.lane.b32.xlu0 %v2551_v54, %s2856_s19 }
 0x3ac   : > { %2527 = vrot.lane.b32.xlu1 %v2541_v36, %s2848_s25 }
 0x3ad   : > { %v979_v59 = vpop.permute.xlu1 %978  ;;  %v2556_v60 = vpack.i.bf16 %v976_v58, %v975_v57 }
 0x3ae   : > { %v986_v62 = vmul.f32 %v979_v59, %v893_v31  ;;  %v982_v9 = vsel %vm593_vm4, %v979_v59, %v981_v55 }
 0x3af   : > { %2557 = vrot.lane.b32.xlu0 %v2556_v60, %s2857_s20  ;;  %v987_v13 = vmul.f32 %v982_v9, %v894_v32  ;;  %v3164_v9 = vpop.f32.mrb[0].mxu0 }
 0x3b0   : > { %2532 = vrot.lane.b32.xlu1 %v2541_v36, %s2852_s13 }
 0x3b1   : > { %v911_v63 = vpop.permute.xlu1 %910 }
 0x3b2   : > { %v914_v0 = vsel %vm519_vm5, %v911_v63, %v913_v61  ;;  %v918_v21 = vmul.f32 0.0, %v911_v63 }
 0x3b3   : > { %v919_v4 = vmul.f32 %v914_v0, %v893_v31  ;;  %1063 = vrot.lane.b32.xlu0 %v986_v62, %s3506_s22 }
 0x3b4   : > { %2537 = vrot.lane.b32.xlu1 %v2536_v39, %s2854_s15 }
 0x3b5   : > { %v2561_v8 = vpack.i.bf16 %v920_v3, %v919_v4  ;;  %v1004_v15 = vpop.permute.xlu1 %1003 }
 0x3b7   : > { %1067 = vrot.lane.b32.xlu0 %v988_v2, %s3506_s22 }
 0x3b8   : > { %1045 = vrot.lane.b32.xlu1 %v977_v7, %s2857_s20 }
 0x3bc   : > { %1056 = vrot.lane.b32.xlu1 %v2846_v1, %s2855_s16 }
 0x3c0   : > { %1065 = vrot.lane.b32.xlu1 %v987_v13, %s3506_s22  ;;  %v3166_v13 = vpop.f32.mrb[1].mxu0 }
 0x3c4   : > { %2562 = vrot.lane.b32.xlu1 %v2561_v8, %s2851_s12 }
 0x40e   : > { %v1015_v11 = vpop.permute.xlu0 %1014 }
 0x412   : > { %v3131_v16 = vpop.permute.xlu0 %2542 }
 0x413   : > { %v2545_v46 = vunpack.i.h.bf16 %v3131_v16  ;;  %v2544_v47 = vunpack.i.l.bf16 %v3131_v16 }
 0x415   : > { %v1058_v58 = vsel %vm674_vm8, %v2544_v47, %v2545_v46 }
 0x416   : > { %v2548_v22 = vpop.permute.xlu0 %2547 }
 0x417   : > { %v2550_v28 = vunpack.i.h.bf16 %v2548_v22  ;;  %v2549_v29 = vunpack.i.l.bf16 %v2548_v22 }
 0x419   : > { %v1021_v37 = vsel %vm633_vm6, %v2549_v29, %v2550_v28  ;;  %v1020_v48 = vsel %vm633_vm6, %v1015_v11, %v2549_v29  ;;  %v469_v11 = vadd.f32 %v3166_v13, %v3164_v9 }
 0x41a   : > { %v1035_v17 = vpop.permute.xlu1 %1034  ;;  %v2586_v42 = vpack.i.bf16 %v2550_v28, %v1021_v37 }
 0x41d   : > { %v2553_v38 = vpop.permute.xlu0 %2552 }
 0x41e   : > { %v2528_v18 = vpop.permute.xlu1 %2527  ;;  %v2555_v43 = vunpack.i.h.bf16 %v2553_v38  ;;  %v2554_v44 = vunpack.i.l.bf16 %v2553_v38 }
 0x41f   : > { %v2530_v19 = vunpack.i.h.bf16 %v2528_v18  ;;  %v2529_v20 = vunpack.i.l.bf16 %v2528_v18 }
 0x420   : > { %v1036_v54 = vsel %vm650_vm9, %v2554_v44, %v2555_v43  ;;  %v1037_v55 = vsel %vm650_vm9, %v2555_v43, %v1035_v17 }
 0x421   : > { %v999_v23 = vsel %vm554_vm0, %v2529_v20, %v2530_v19  ;;  %v998_v24 = vsel %vm554_vm0, %v993_v12, %v2529_v20  ;;  %v2558_v49 = vpop.permute.xlu0 %2557  ;;  %v2606_v60 = vpack.i.bf16 %v1037_v55, %v1036_v54  ;;  %v467_v12 = vmul.f32 %v3164_v9, %v3164_v9 }
 0x422   : > { %v2533_v25 = vpop.permute.xlu1 %2532  ;;  %v2566_v26 = vpack.i.bf16 %v2530_v19, %v999_v23  ;;  %v2571_v27 = vpack.i.bf16 %v998_v24, %v918_v21  ;;  %v2560_v56 = vunpack.i.h.bf16 %v2558_v49  ;;  %v2559_v57 = vunpack.i.l.bf16 %v2558_v49 }
 0x423   : > { %v2535_v30 = vunpack.i.h.bf16 %v2533_v25  ;;  %v2534_v31 = vunpack.i.l.bf16 %v2533_v25 }
 0x424   : > { %2567 = vrot.lane.b32.xlu0 %v2566_v26, %s2851_s12  ;;  %2572 = vrot.lane.b32.xlu1 %v2571_v27, %s2851_s12  ;;  %v1047_v63 = vsel %vm662_vm10, %v2559_v57, %v2560_v56  ;;  %v2616_v4 = vpack.i.bf16 %v2544_v47, %v2559_v57 }
 0x425   : > { %v1026_v32 = vsel %vm519_vm5, %v2534_v31, %v2535_v30  ;;  %v2591_v52 = vpack.i.bf16 %v2554_v44, %v2534_v31  ;;  %v1064_v0 = vpop.permute.xlu0 %1063 }
 0x426   : > { %v2538_v33 = vpop.permute.xlu1 %2537  ;;  %v2576_v34 = vpack.i.bf16 %v2535_v30, %v1026_v32 }
 0x427   : > { %v2540_v35 = vunpack.i.h.bf16 %v2538_v33  ;;  %v2539_v36 = vunpack.i.l.bf16 %v2538_v33 }
 0x428   : > { %2577 = vrot.lane.b32.xlu1 %v2576_v34, %s2851_s12 }
 0x429   : > { %v1010_v39 = vsel %vm621_vm7, %v2539_v36, %v2540_v35  ;;  %v1009_v45 = vsel %vm621_vm7, %v1004_v15, %v2539_v36  ;;  %v1068_v7 = vpop.permute.xlu0 %1067  ;;  %v468_v15 = vmul.f32 %v3166_v13, %v3166_v13 }
 0x42a   : > { %v1046_v40 = vpop.permute.xlu1 %1045  ;;  %v2581_v41 = vpack.i.bf16 %v2540_v35, %v1010_v39  ;;  %v2601_v51 = vpack.i.bf16 %v1020_v48, %v1009_v45 }
 0x42b   : > { %v1048_v61 = vsel %vm662_vm10, %v2560_v56, %v1046_v40  ;;  %v472_v16 = vadd.f32 %v468_v15, %v467_v12 }
 0x42c   : > { %2582 = vrot.lane.b32.xlu0 %v2581_v41, %s2851_s12  ;;  %2587 = vrot.lane.b32.xlu1 %v2586_v42, %s2851_s12  ;;  %v2611_v2 = vpack.i.bf16 %v1048_v61, %v1047_v63 }
 0x42e   : > { %v1057_v50 = vpop.permute.xlu1 %1056 }
 0x42f   : > { %v1059_v53 = vsel %vm674_vm8, %v2545_v46, %v1057_v50 }
 0x430   : > { %2602 = vrot.lane.b32.xlu0 %v2601_v51, %s2851_s12  ;;  %2592 = vrot.lane.b32.xlu1 %v2591_v52, %s2851_s12  ;;  %v2596_v59 = vpack.i.bf16 %v1059_v53, %v1058_v58 }
 0x432   : > { %v1066_v62 = vpop.permute.xlu1 %1065 }
 0x433   : > { %v1069_v3 = vsel %vm686_vm11, %v1064_v0, %v1066_v62  ;;  %v1070_v8 = vsel %vm686_vm11, %v1066_v62, %v1068_v7 }
 0x434   : > { %2607 = vrot.lane.b32.xlu0 %v2606_v60, %s2851_s12  ;;  %2597 = vrot.lane.b32.xlu1 %v2596_v59, %s2851_s12 }
 0x436   : > { %v2563_v17 = vpop.permute.xlu1 %2562 }
 0x437   : > { %v2565_v18 = vunpack.i.h.bf16 %v2563_v17  ;;  %v2564_v19 = vunpack.i.l.bf16 %v2563_v17 }
 0x438   : > { %2612 = vrot.lane.b32.xlu0 %v2611_v2, %s2851_s12  ;;  %1125 = vrot.lane.b32.xlu1 %v1069_v3, %s2851_s12 }
 0x439   : > { %v1130_v28 = vsel %vm593_vm4, %v2564_v19, %v2565_v18 }
 0x43c   : > { %2617 = vrot.lane.b32.xlu0 %v2616_v4, %s2851_s12  ;;  %1123 = vrot.lane.b32.xlu1 %v1064_v0, %s2851_s12 }
 0x440   : > { %1127 = vrot.lane.b32.xlu0 %v1070_v8, %s2851_s12 }
 0x45f   : > { %470 = vadd.xlane.f32.xlu0 %v469_v11 }
 0x463   : > { %473 = vadd.xlane.f32.xlu0 %v472_v16 }
 0x496   : > { %v2568_v20 = vpop.permute.xlu0 %2567  ;;  %v2573_v21 = vpop.permute.xlu1 %2572 }
 0x497   : > { %v2570_v22 = vunpack.i.h.bf16 %v2568_v20  ;;  %v2569_v23 = vunpack.i.l.bf16 %v2568_v20  ;;  %v2575_v24 = vunpack.i.h.bf16 %v2573_v21  ;;  %v2574_v25 = vunpack.i.l.bf16 %v2573_v21 }
 0x499   : > { %v1131_v26 = vsel %vm593_vm4, %v2575_v24, %v2569_v23  ;;  %v1129_v27 = vsel %vm593_vm4, %v2574_v25, %v2564_v19  ;;  %v1132_v29 = vsel %vm593_vm4, %v2569_v23, %v2570_v22  ;;  %v1071_v24 = vld [vmem:[%s3494_s3] sm:$0xff] }
 0x49a   : > { %v2578_v30 = vpop.permute.xlu1 %2577  ;;  %v2353_v31 = vpack.c.bf16 %v1132_v29, %v1130_v28  ;;  %v2355_v32 = vpack.c.bf16 %v1131_v26, %v1129_v27  ;;  %v2860_v26 = vmov 0  }
 0x49b   : > { %v2580_v46 = vunpack.i.h.bf16 %v2578_v30  ;;  %v2579_v47 = vunpack.i.l.bf16 %v2578_v30  ;;  %2621 = vset.pattern.permute.xlu1 %v2860_v26 }
 0x49c   : > { %2354 = vmatprep.subr.bf16.mxu0 %v2353_v31 }
 0x49d   : > { %2356 = vmatpush1.bf16.msra.mxu0 %v2355_v32  ;;  %v1138_v58 = vsel %vm593_vm4, %v2579_v47, %v2580_v46 }
 0x49e   : > { %v2583_v33 = vpop.permute.xlu0 %2582  ;;  %v2588_v34 = vpop.permute.xlu1 %2587 }
 0x49f   : > { %v2585_v35 = vunpack.i.h.bf16 %v2583_v33  ;;  %v2584_v36 = vunpack.i.l.bf16 %v2583_v33  ;;  %v2590_v37 = vunpack.i.h.bf16 %v2588_v34  ;;  %v2589_v38 = vunpack.i.l.bf16 %v2588_v34 }
 0x4a1   : > { %v1134_v39 = vsel %vm593_vm4, %v2584_v36, %v2585_v35  ;;  %v1136_v40 = vsel %vm593_vm4, %v2589_v38, %v2590_v37 }
 0x4a2   : > { %v2603_v41 = vpop.permute.xlu0 %2602  ;;  %v2593_v42 = vpop.permute.xlu1 %2592  ;;  %v2357_v43 = vpack.c.bf16 %v1136_v40, %v1134_v39 }
 0x4a3   : > { %v2605_v44 = vunpack.i.h.bf16 %v2603_v41  ;;  %v2604_v45 = vunpack.i.l.bf16 %v2603_v41  ;;  %v2594_v48 = vunpack.i.l.bf16 %v2593_v42  ;;  %v2595_v54 = vunpack.i.h.bf16 %v2593_v42 }
 0x4a4   : > { %2358 = vmatprep.subr.bf16.mxu0 %v2357_v43 }
 0x4a5   : > { %v1133_v49 = vsel %vm593_vm4, %v2604_v45, %v2584_v36  ;;  %v1135_v50 = vsel %vm593_vm4, %v2605_v44, %v2589_v38  ;;  %v1137_v57 = vsel %vm593_vm4, %v2594_v48, %v2579_v47  ;;  %v2861_v44 = vmov 2  }
 0x4a6   : > { %v2608_v51 = vpop.permute.xlu0 %2607  ;;  %v2598_v52 = vpop.permute.xlu1 %2597  ;;  %v2359_v53 = vpack.c.bf16 %v1135_v50, %v1133_v49  ;;  %2622 = vset.pattern.permute.xlu0 %v2861_v44 }
 0x4a7   : > { %v2610_v55 = vunpack.i.h.bf16 %v2608_v51  ;;  %v2609_v56 = vunpack.i.l.bf16 %v2608_v51  ;;  %v2600_v60 = vunpack.i.h.bf16 %v2598_v52  ;;  %v2599_v61 = vunpack.i.l.bf16 %v2598_v52 }
 0x4a8   : > { %2360 = vmatpush1.bf16.msra.mxu0 %v2359_v53  ;;  %v2329_v53 = vld [vmem:[%s3501_s10 + $0x2] ss:$4 sm:$0x3] }
 0x4a9   : > { %v1139_v59 = vsel %vm593_vm4, %v2595_v54, %v2609_v56  ;;  %v1140_v62 = vsel %vm593_vm4, %v2609_v56, %v2610_v55  ;;  %v1144_v8 = vsel %vm593_vm4, %v2599_v61, %v2600_v60  ;;  %v1527_v56 = vrot.slane %v2329_v53, %v2944_v6 }
 0x4aa   : > { %v2613_v63 = vpop.permute.xlu0 %2612  ;;  %v2361_v0 = vpack.c.bf16 %v1140_v62, %v1138_v58  ;;  %v2363_v2 = vpack.c.bf16 %v1139_v59, %v1137_v57  ;;  %v1126_v12 = vpop.permute.xlu1 %1125  ;;  %v1497_v57 = vld [vmem:[%s3501_s10] ss:$4 sm:$0x3]  ;;  %v1523_v59 = vrot.slane %v2329_v53, %v2942_v5 }
 0x4ab   : > { %v2615_v3 = vunpack.i.h.bf16 %v2613_v63  ;;  %v2614_v4 = vunpack.i.l.bf16 %v2613_v63  ;;  %v1506_v60 = vrot.slane %v1497_v57, %v2944_v6 }
 0x4ac   : > { %2362 = vmatprep.subr.bf16.mxu0 %v2361_v0 }
 0x4ad   : > { %2364 = vmatpush1.bf16.msra.mxu0 %v2363_v2  ;;  %v1142_v7 = vsel %vm593_vm4, %v2614_v4, %v2615_v3 }
 0x4ae   : > { %v2618_v11 = vpop.permute.xlu0 %2617  ;;  %v2365_v15 = vpack.c.bf16 %v1144_v8, %v1142_v7  ;;  %v1124_v23 = vpop.permute.xlu1 %1123 }
 0x4af   : > { %v2620_v16 = vunpack.i.h.bf16 %v2618_v11  ;;  %v2619_v17 = vunpack.i.l.bf16 %v2618_v11  ;;  %v1145_v25 = vsel %vm593_vm4, %v1124_v23, %v1126_v12 }
 0x4b0   : > { %2366 = vmatprep.subr.bf16.mxu0 %v2365_v15 }
 0x4b1   : > { %v1141_v18 = vsel %vm593_vm4, %v2619_v17, %v2614_v4  ;;  %v1143_v19 = vsel %vm593_vm4, %v2620_v16, %v2599_v61 }
 0x4b2   : > { %v1128_v20 = vpop.permute.xlu0 %1127  ;;  %v2367_v21 = vpack.c.bf16 %v1143_v19, %v1141_v18 }
 0x4b3   : > { %v1146_v22 = vsel %vm593_vm4, %v1126_v12, %v1128_v20 }
 0x4b4   : > { %2368 = vmatpush1.bf16.msra.mxu0 %v2367_v21 }
 0x4b5   : > { %1184 = vmatprep.subr.mxu0 %v1146_v22 }
 0x4b8   : > { %1185 = vmatpush1.msra.mxu0 %v1145_v25 }
 0x4b9   : > { %2326 = vmatmul.mubr.msk.f32.vlgmr.msra.gmra.mrb[2].mxu0 %vm783_vm12, %v1071_v24 }
 0x4ba   : > { %1452 = vmatprep.mubr.f32.mxu0 %v2846_v1 }
 0x4ec   : > { %v471_v27 = vpop.xlane.xlu0 %470 }
 0x4ed   : > { %v475_v28 = vmul.f32 0.00390625, %v471_v27 }
 0x4ef   : > { %v477_v30 = vmul.f32 %v475_v28, %v475_v28 }
 0x4f0   : > { %v474_v29 = vpop.xlane.xlu0 %473 }
 0x4f1   : > { %v476_v31 = vmul.f32 0.00390625, %v474_v29 }
 0x4f3   : > { %v478_v32 = vsub.f32 %v476_v31, %v477_v30 }
 0x4f5   : > { %v480_v33 = vadd.f32 1e-05, %v478_v32 }
 0x4f7   : > { %2824 = vrsqrt.f32 %v480_v33 }
 0x501   : > { %v2825_v40 = vpop.eup %2824 }
 0x502   : > { %v482_v41 = vmul.f32 %v2825_v40, %v3075_v10 }
 0x504   : > { %v484_v42 = vmul.f32 %v482_v41, %v475_v28 }
 0x506   : > { %v485_v43 = vsub.f32 %v3084_v14, %v484_v42 }
 0x58c   : > { %v1234_v34 = vpop.f32.mrb[2].mxu0 }
 0x58d   : > { %v1236_v35 = vpop.f32.mrb[3].mxu0  ;;  %v1239_v36 = vmul.f32 %v1234_v34, %v1234_v34 }
 0x58e   : > { %v1241_v37 = vadd.f32 %v1236_v35, %v1234_v34  ;;  %v1240_v38 = vmul.f32 %v1236_v35, %v1236_v35 }
 0x590   : > { %1242 = vadd.xlane.f32.xlu1 %v1241_v37  ;;  %v1244_v39 = vadd.f32 %v1240_v38, %v1239_v36 }
 0x592   : > { %1245 = vadd.xlane.f32.xlu0 %v1244_v39 }
 0x5a1   : > { %488 = vperm.xlu1 %2621, %v482_v41  }
 0x5a5   : > { %495 = vperm.xlu1 %2621, %v485_v43  }
 0x5a9   : > { %2623 = vset.pattern.permute.xlu1 %v2861_v44 }
 0x61d   : > { %v1243_v45 = vpop.xlane.xlu1 %1242 }
 0x61e   : > { %v1247_v46 = vmul.f32 0.00390625, %v1243_v45 }
 0x61f   : > { %v1246_v47 = vpop.xlane.xlu0 %1245 }
 0x620   : > { %v1249_v48 = vmul.f32 %v1247_v46, %v1247_v46  ;;  %v1248_v49 = vmul.f32 0.00390625, %v1246_v47 }
 0x622   : > { %v1250_v50 = vsub.f32 %v1248_v49, %v1249_v48 }
 0x624   : > { %v1252_v51 = vadd.f32 1e-05, %v1250_v50 }
 0x626   : > { %2826 = vrsqrt.f32 %v1252_v51 }
 0x630   : > { %v2827_v52 = vpop.eup %2826 }
 0x631   : > { %v1254_v54 = vmul.f32 %v2827_v52, %v3075_v10  ;;  %v1502_v10 = vrot.slane %v1497_v57, %v2942_v5 }
 0x633   : > { %1260 = vperm.xlu0 %2622, %v1254_v54   ;;  %v1256_v55 = vmul.f32 %v1254_v54, %v1247_v46 }
 0x635   : > { %v1257_v58 = vsub.f32 %v3084_v14, %v1256_v55  ;;  %v489_v14 = vpop.permute.xlu1 %488 }
 0x636   : > { %v491_v63 = vmul.f32 %v489_v14, %v3164_v9  ;;  %v492_v0 = vmul.f32 %v489_v14, %v3166_v13 }
 0x637   : > { %1267 = vperm.xlu1 %2623, %v1257_v58   ;;  %1555 = vrot.lane.b32.xlu0 %v1527_v56, %s2849_s29 }
 0x639   : > { %v496_v61 = vpop.permute.xlu1 %495 }
 0x63a   : > { %v498_v7 = vadd.f32 %v496_v61, %v491_v63  ;;  %v499_v8 = vadd.f32 %v496_v61, %v492_v0  ;;  %v1278_v61 = vld [vmem:[%s3495_s4] sm:$0xff] }
 0x63b   : > { %1566 = vrot.lane.b32.xlu0 %v1506_v60, %s2850_s30  ;;  %1528 = vrot.lane.b32.xlu1 %v1523_v59, %s2847_s24 }
 0x63f   : > { %1577 = vrot.lane.b32.xlu0 %v1527_v56, %s2851_s12  ;;  %1530 = vrot.lane.b32.xlu1 %v1527_v56, %s2847_s24 }
 0x643   : > { %1509 = vrot.lane.b32.xlu0 %v1506_v60, %s2852_s13  ;;  %1539 = vrot.lane.b32.xlu1 %v1502_v10, %s2848_s25 }
 0x647   : > { %1541 = vrot.lane.b32.xlu1 %v1506_v60, %s2848_s25  ;;  %1589 = vrot.lane.b32.xlu0 %v2846_v1, %s2848_s25 }
 0x64b   : > { %1553 = vrot.lane.b32.xlu1 %v1523_v59, %s2849_s29 }
 0x64f   : > { %1564 = vrot.lane.b32.xlu1 %v1502_v10, %s2850_s30 }
 0x653   : > { %1575 = vrot.lane.b32.xlu1 %v1523_v59, %s2851_s12 }
 0x657   : > { %1507 = vrot.lane.b32.xlu1 %v1502_v10, %s2852_s13 }
 0x6b2   : > { %v1261_v62 = vpop.permute.xlu0 %1260 }
 0x6b3   : > { %v1263_v2 = vmul.f32 %v1261_v62, %v1234_v34  ;;  %v1264_v3 = vmul.f32 %v1261_v62, %v1236_v35 }
 0x6b6   : > { %v1268_v4 = vpop.permute.xlu1 %1267  ;;  %v1556_v21 = vpop.permute.xlu0 %1555 }
 0x6b7   : > { %v1270_v12 = vadd.f32 %v1268_v4, %v1263_v2  ;;  %v1271_v11 = vadd.f32 %v1268_v4, %v1264_v3  ;;  %v1563_v22 = vmul.f32 0.0, %v1556_v21 }
 0x6b9   : > { %v1272_v15 = vadd.f32 %v1270_v12, %v498_v7  ;;  %v1273_v16 = vadd.f32 %v1271_v11, %v499_v8 }
 0x6ba   : > { %v1529_v17 = vpop.permute.xlu1 %1528  ;;  %v1567_v34 = vpop.permute.xlu0 %1566 }
 0x6bb   : > { %v1274_v18 = vmul.f32 0.01, %v1272_v15  ;;  %v1275_v19 = vmul.f32 0.01, %v1273_v16  ;;  %v1536_v20 = vmul.f32 0.0, %v1529_v17  ;;  %v1574_v41 = vmul.f32 0.0, %v1567_v34 }
 0x6bd   : > { %v3227_v23 = vmax.f32 %v1272_v15, %v1274_v18  ;;  %v3229_v9 = vmax.f32 %v1273_v16, %v1275_v19  ;;  %1600 = vrot.lane.b32.xlu1 %v1536_v20, %s2854_s15 }
 0x6be   : > { %v1531_v13 = vpop.permute.xlu1 %1530  ;;  %v1578_v44 = vpop.permute.xlu0 %1577 }
 0x6bf   : > { %1282 = vmatprep.subr.mxu1 %v3229_v9  ;;  %v2624_v26 = vpack.i.bf16 %v3229_v9, %v3227_v23  ;;  %v1532_v27 = vsel %vm542_vm1, %v1529_v17, %v1531_v13  ;;  %v1538_v30 = vmul.f32 %v1531_v13, %v3229_v9  ;;  %v1585_v58 = vmul.f32 0.0, %v1578_v44 }
 0x6c0   : > { %1283 = vmatpush1.msra.mxu1 %v3227_v23  ;;  %v1537_v29 = vmul.f32 %v1532_v27, %v3227_v23 }
 0x6c1   : > { %1631 = vrot.lane.b32.xlu1 %v1563_v22, %s2856_s19  ;;  %2327 = vmatmul.mubr.msk.f32.vlgmr.msra.gmra.mrb[2].mxu1 %vm392_vm13, %v1278_v61 }
 0x6c2   : > { %v1540_v24 = vpop.permute.xlu1 %1539  ;;  %v2634_v37 = vpack.i.bf16 %v1538_v30, %v1537_v29  ;;  %v1510_v51 = vpop.permute.xlu0 %1509  ;;  %1829 = vmatprep.mubr.f32.mxu1 %v2846_v1 }
 0x6c3   : > { %v1547_v25 = vmul.f32 0.0, %v1540_v24  ;;  %v1517_v56 = vmul.f32 %v1510_v51, %v3229_v9 }
 0x6c5   : > { %2625 = vrot.lane.b32.xlu1 %v2624_v26, %s2848_s25  ;;  %1611 = vrot.lane.b32.xlu0 %v1547_v25, %s2853_s14 }
 0x6c6   : > { %v1542_v28 = vpop.permute.xlu1 %1541  ;;  %v1590_v10 = vpop.permute.xlu0 %1589 }
 0x6c7   : > { %v1543_v31 = vsel %vm554_vm0, %v1540_v24, %v1542_v28  ;;  %v1549_v32 = vmul.f32 %v1542_v28, %v3229_v9 }
 0x6c8   : > { %v1548_v33 = vmul.f32 %v1543_v31, %v3227_v23 }
 0x6c9   : > { %2630 = vrot.lane.b32.xlu1 %v2624_v26, %s2852_s13  ;;  %2640 = vrot.lane.b32.xlu0 %v2624_v26, %s2855_s16 }
 0x6ca   : > { %v2644_v35 = vpack.i.bf16 %v1549_v32, %v1548_v33  ;;  %v1554_v36 = vpop.permute.xlu1 %1553 }
 0x6cb   : > { %v1557_v38 = vsel %vm569_vm2, %v1554_v36, %v1556_v21  ;;  %v1561_v39 = vmul.f32 %v1554_v36, %v3227_v23 }
 0x6cc   : > { %v1562_v40 = vmul.f32 %v1557_v38, %v3229_v9 }
 0x6cd   : > { %2635 = vrot.lane.b32.xlu1 %v2634_v37, %s2854_s15  ;;  %2645 = vrot.lane.b32.xlu0 %v2644_v35, %s2853_s14 }
 0x6ce   : > { %v2649_v42 = vpack.i.bf16 %v1562_v40, %v1561_v39  ;;  %v1565_v43 = vpop.permute.xlu1 %1564 }
 0x6cf   : > { %v1568_v45 = vsel %vm581_vm3, %v1565_v43, %v1567_v34  ;;  %v1572_v46 = vmul.f32 %v1565_v43, %v3227_v23 }
 0x6d0   : > { %v1573_v47 = vmul.f32 %v1568_v45, %v3229_v9 }
 0x6d1   : > { %1642 = vrot.lane.b32.xlu1 %v1574_v41, %s2857_s20  ;;  %2650 = vrot.lane.b32.xlu0 %v2649_v42, %s2856_s19 }
 0x6d2   : > { %v2654_v48 = vpack.i.bf16 %v1573_v47, %v1572_v46  ;;  %v1576_v49 = vpop.permute.xlu1 %1575 }
 0x6d3   : > { %v1579_v50 = vsel %vm593_vm4, %v1576_v49, %v1578_v44  ;;  %v1583_v53 = vmul.f32 %v1576_v49, %v3227_v23 }
 0x6d4   : > { %v1584_v54 = vmul.f32 %v1579_v50, %v3229_v9 }
 0x6d5   : > { %1653 = vrot.lane.b32.xlu1 %v2846_v1, %s2855_s16  ;;  %2655 = vrot.lane.b32.xlu0 %v2654_v48, %s2857_s20 }
 0x6d6   : > { %v1508_v52 = vpop.permute.xlu1 %1507 }
 0x6d7   : > { %v1511_v55 = vsel %vm519_vm5, %v1508_v52, %v1510_v51  ;;  %v1515_v3 = vmul.f32 0.0, %v1508_v52 }
 0x6d8   : > { %v1516_v57 = vmul.f32 %v1511_v55, %v3227_v23 }
 0x6d9   : > { %1660 = vrot.lane.b32.xlu0 %v1583_v53, %s3506_s22  ;;  %1662 = vrot.lane.b32.xlu1 %v1584_v54, %s3506_s22 }
 0x6da   : > { %v2659_v59 = vpack.i.bf16 %v1517_v56, %v1516_v57 }
 0x6dd   : > { %1664 = vrot.lane.b32.xlu0 %v1585_v58, %s3506_s22  ;;  %2660 = vrot.lane.b32.xlu1 %v2659_v59, %s2851_s12 }
 0x72f   : > { %v1601_v60 = vpop.permute.xlu1 %1600 }
 0x733   : > { %v1632_v14 = vpop.permute.xlu1 %1631 }
 0x737   : > { %v1612_v62 = vpop.permute.xlu0 %1611  ;;  %v2626_v63 = vpop.permute.xlu1 %2625 }
 0x738   : > { %v2628_v0 = vunpack.i.h.bf16 %v2626_v63  ;;  %v2627_v2 = vunpack.i.l.bf16 %v2626_v63 }
 0x73a   : > { %v1596_v4 = vsel %vm554_vm0, %v2627_v2, %v2628_v0  ;;  %v1595_v7 = vsel %vm554_vm0, %v1590_v10, %v2627_v2 }
 0x73b   : > { %v2664_v8 = vpack.i.bf16 %v2628_v0, %v1596_v4  ;;  %v2669_v12 = vpack.i.bf16 %v1595_v7, %v1515_v3  ;;  %v2641_v11 = vpop.permute.xlu0 %2640  ;;  %v2631_v15 = vpop.permute.xlu1 %2630 }
 0x73c   : > { %v2633_v16 = vunpack.i.h.bf16 %v2631_v15  ;;  %v2632_v17 = vunpack.i.l.bf16 %v2631_v15  ;;  %v2643_v36 = vunpack.i.h.bf16 %v2641_v11  ;;  %v2642_v37 = vunpack.i.l.bf16 %v2641_v11 }
 0x73d   : > { %2665 = vrot.lane.b32.xlu0 %v2664_v8, %s2851_s12  ;;  %2670 = vrot.lane.b32.xlu1 %v2669_v12, %s2851_s12 }
 0x73e   : > { %v1623_v18 = vsel %vm519_vm5, %v2632_v17, %v2633_v16  ;;  %v1655_v47 = vsel %vm674_vm8, %v2642_v37, %v2643_v36 }
 0x73f   : > { %v2674_v19 = vpack.i.bf16 %v2633_v16, %v1623_v18  ;;  %v2646_v20 = vpop.permute.xlu0 %2645  ;;  %v2636_v21 = vpop.permute.xlu1 %2635 }
 0x740   : > { %v2648_v22 = vunpack.i.h.bf16 %v2646_v20  ;;  %v2647_v13 = vunpack.i.l.bf16 %v2646_v20  ;;  %v2638_v24 = vunpack.i.h.bf16 %v2636_v21  ;;  %v2637_v25 = vunpack.i.l.bf16 %v2636_v21 }
 0x741   : > { %2675 = vrot.lane.b32.xlu1 %v2674_v19, %s2851_s12 }
 0x742   : > { %v1618_v26 = vsel %vm633_vm6, %v2647_v13, %v2648_v22  ;;  %v1607_v27 = vsel %vm621_vm7, %v2637_v25, %v2638_v24  ;;  %v1617_v32 = vsel %vm633_vm6, %v1612_v62, %v2647_v13  ;;  %v1606_v33 = vsel %vm621_vm7, %v1601_v60, %v2637_v25 }
 0x743   : > { %v2684_v28 = vpack.i.bf16 %v2648_v22, %v1618_v26  ;;  %v2679_v29 = vpack.i.bf16 %v2638_v24, %v1607_v27  ;;  %v2651_v30 = vpop.permute.xlu0 %2650  ;;  %v1643_v31 = vpop.permute.xlu1 %1642  ;;  %v2699_v39 = vpack.i.bf16 %v1617_v32, %v1606_v33 }
 0x744   : > { %v2653_v34 = vunpack.i.h.bf16 %v2651_v30  ;;  %v2652_v35 = vunpack.i.l.bf16 %v2651_v30 }
 0x745   : > { %2680 = vrot.lane.b32.xlu0 %v2679_v29, %s2851_s12  ;;  %2685 = vrot.lane.b32.xlu1 %v2684_v28, %s2851_s12 }
 0x746   : > { %v2689_v38 = vpack.i.bf16 %v2652_v35, %v2632_v17  ;;  %v1633_v40 = vsel %vm650_vm9, %v2652_v35, %v2653_v34  ;;  %v1634_v43 = vsel %vm650_vm9, %v2653_v34, %v1632_v14 }
 0x747   : > { %v2656_v41 = vpop.permute.xlu0 %2655  ;;  %v1654_v42 = vpop.permute.xlu1 %1653  ;;  %v2704_v48 = vpack.i.bf16 %v1634_v43, %v1633_v40 }
 0x748   : > { %v2658_v44 = vunpack.i.h.bf16 %v2656_v41  ;;  %v2657_v45 = vunpack.i.l.bf16 %v2656_v41  ;;  %v1656_v46 = vsel %vm674_vm8, %v2643_v36, %v1654_v42 }
 0x749   : > { %2700 = vrot.lane.b32.xlu0 %v2699_v39, %s2851_s12  ;;  %2690 = vrot.lane.b32.xlu1 %v2689_v38, %s2851_s12  ;;  %v2694_v49 = vpack.i.bf16 %v1656_v46, %v1655_v47 }
 0x74a   : > { %v1644_v50 = vsel %vm662_vm10, %v2657_v45, %v2658_v44  ;;  %v1645_v51 = vsel %vm662_vm10, %v2658_v44, %v1643_v31  ;;  %v2714_v56 = vpack.i.bf16 %v2642_v37, %v2657_v45 }
 0x74b   : > { %v1661_v52 = vpop.permute.xlu0 %1660  ;;  %v1663_v53 = vpop.permute.xlu1 %1662  ;;  %v2709_v54 = vpack.i.bf16 %v1645_v51, %v1644_v50 }
 0x74c   : > { %v1666_v55 = vsel %vm686_vm11, %v1661_v52, %v1663_v53 }
 0x74d   : > { %2705 = vrot.lane.b32.xlu0 %v2704_v48, %s2851_s12  ;;  %2695 = vrot.lane.b32.xlu1 %v2694_v49, %s2851_s12 }
 0x74f   : > { %v1665_v57 = vpop.permute.xlu0 %1664  ;;  %v2661_v59 = vpop.permute.xlu1 %2660 }
 0x750   : > { %v1667_v58 = vsel %vm686_vm11, %v1663_v53, %v1665_v57  ;;  %v2663_v60 = vunpack.i.h.bf16 %v2661_v59  ;;  %v2662_v10 = vunpack.i.l.bf16 %v2661_v59 }
 0x751   : > { %2710 = vrot.lane.b32.xlu0 %v2709_v54, %s2851_s12  ;;  %1722 = vrot.lane.b32.xlu1 %v1666_v55, %s2851_s12 }
 0x752   : > { %v1727_v7 = vsel %vm593_vm4, %v2662_v10, %v2663_v60 }
 0x755   : > { %2715 = vrot.lane.b32.xlu0 %v2714_v56, %s2851_s12  ;;  %1720 = vrot.lane.b32.xlu1 %v1661_v52, %s2851_s12 }
 0x759   : > { %1724 = vrot.lane.b32.xlu0 %v1667_v58, %s2851_s12 }
 0x7af   : > { %v2666_v14 = vpop.permute.xlu0 %2665  ;;  %v2671_v61 = vpop.permute.xlu1 %2670 }
 0x7b0   : > { %v2668_v62 = vunpack.i.h.bf16 %v2666_v14  ;;  %v2667_v63 = vunpack.i.l.bf16 %v2666_v14  ;;  %v2673_v0 = vunpack.i.h.bf16 %v2671_v61  ;;  %v2672_v2 = vunpack.i.l.bf16 %v2671_v61 }
 0x7b2   : > { %v1728_v3 = vsel %vm593_vm4, %v2673_v0, %v2667_v63  ;;  %v1726_v4 = vsel %vm593_vm4, %v2672_v2, %v2662_v10  ;;  %v1729_v8 = vsel %vm593_vm4, %v2667_v63, %v2668_v62  ;;  %v1668_v62 = vld [vmem:[%s3497_s6] sm:$0xff]  ;;  %v3326_v0 = vpop.f32.mrb[2].mxu1 }
 0x7b3   : > { %v2371_v12 = vpack.c.bf16 %v1728_v3, %v1726_v4  ;;  %v2676_v11 = vpop.permute.xlu1 %2675  ;;  %v2369_v15 = vpack.c.bf16 %v1729_v8, %v1727_v7  ;;  %v3328_v2 = vpop.f32.mrb[3].mxu1  ;;  %v1353_v4 = vmul.f32 %v3326_v0, %v3326_v0 }
 0x7b4   : > { %v2678_v29 = vunpack.i.h.bf16 %v2676_v11  ;;  %v2677_v30 = vunpack.i.l.bf16 %v2676_v11  ;;  %v1355_v3 = vadd.f32 %v3328_v2, %v3326_v0  ;;  %v1354_v7 = vmul.f32 %v3328_v2, %v3328_v2 }
 0x7b5   : > { %2370 = vmatprep.subr.bf16.mxu1 %v2369_v15 }
 0x7b6   : > { %2372 = vmatpush1.bf16.msra.mxu1 %v2371_v12  ;;  %v1735_v41 = vsel %vm593_vm4, %v2677_v30, %v2678_v29  ;;  %v1358_v8 = vadd.f32 %v1354_v7, %v1353_v4 }
 0x7b7   : > { %v2681_v16 = vpop.permute.xlu0 %2680  ;;  %v2686_v17 = vpop.permute.xlu1 %2685 }
 0x7b8   : > { %v2683_v18 = vunpack.i.h.bf16 %v2681_v16  ;;  %v2682_v19 = vunpack.i.l.bf16 %v2681_v16  ;;  %v2688_v20 = vunpack.i.h.bf16 %v2686_v17  ;;  %v2687_v21 = vunpack.i.l.bf16 %v2686_v17 }
 0x7ba   : > { %v1731_v22 = vsel %vm593_vm4, %v2682_v19, %v2683_v18  ;;  %v1733_v13 = vsel %vm593_vm4, %v2687_v21, %v2688_v20 }
 0x7bb   : > { %v2701_v24 = vpop.permute.xlu0 %2700  ;;  %v2691_v25 = vpop.permute.xlu1 %2690  ;;  %v2373_v26 = vpack.c.bf16 %v1733_v13, %v1731_v22 }
 0x7bc   : > { %v2703_v27 = vunpack.i.h.bf16 %v2701_v24  ;;  %v2702_v28 = vunpack.i.l.bf16 %v2701_v24  ;;  %v2692_v31 = vunpack.i.l.bf16 %v2691_v25  ;;  %v2693_v37 = vunpack.i.h.bf16 %v2691_v25 }
 0x7bd   : > { %2374 = vmatprep.subr.bf16.mxu1 %v2373_v26  ;;  %v2862_v24 = vmov 5  }
 0x7be   : > { %v1730_v32 = vsel %vm593_vm4, %v2702_v28, %v2682_v19  ;;  %v1732_v33 = vsel %vm593_vm4, %v2703_v27, %v2687_v21  ;;  %v1734_v40 = vsel %vm593_vm4, %v2692_v31, %v2677_v30  ;;  %v2331_v19 = vld [vmem:[%s3501_s10 + $0x2] ss:$4 sm:$0x3]  ;;  %v1878_v21 = vld [vmem:[%s3501_s10] ss:$4 sm:$0x3]  ;;  %2719 = vset.pattern.permute.xlu0 %v2862_v24  ;;  %2720 = vset.pattern.permute.xlu1 %v2862_v24 }
 0x7bf   : > { %v2375_v34 = vpack.c.bf16 %v1732_v33, %v1730_v32  ;;  %v2706_v35 = vpop.permute.xlu0 %2705  ;;  %v2696_v36 = vpop.permute.xlu1 %2695  ;;  %v1904_v20 = vrot.slane %v2331_v19, %v2942_v5  ;;  %v1908_v22 = vrot.slane %v2331_v19, %v2944_v6  ;;  %v1883_v13 = vrot.slane %v1878_v21, %v2942_v5 }
 0x7c0   : > { %v2708_v38 = vunpack.i.h.bf16 %v2706_v35  ;;  %v2707_v39 = vunpack.i.l.bf16 %v2706_v35  ;;  %v2698_v43 = vunpack.i.h.bf16 %v2696_v36  ;;  %v2697_v44 = vunpack.i.l.bf16 %v2696_v36 }
 0x7c1   : > { %2376 = vmatpush1.bf16.msra.mxu1 %v2375_v34  ;;  %v1887_v25 = vrot.slane %v1878_v21, %v2944_v6  ;;  %v3367_v6 = vld [vmem:[%s3499_s8] sm:$0xff] }
 0x7c2   : > { %v1736_v42 = vsel %vm593_vm4, %v2693_v37, %v2707_v39  ;;  %v1737_v45 = vsel %vm593_vm4, %v2707_v39, %v2708_v38  ;;  %v1741_v52 = vsel %vm593_vm4, %v2697_v44, %v2698_v43  ;;  %v3373_v34 = vld [vmem:[%s3500_s9] sm:$0xff] }
 0x7c3   : > { %v2379_v46 = vpack.c.bf16 %v1736_v42, %v1734_v40  ;;  %v2711_v47 = vpop.permute.xlu0 %2710  ;;  %v2377_v48 = vpack.c.bf16 %v1737_v45, %v1735_v41  ;;  %v1723_v53 = vpop.permute.xlu1 %1722 }
 0x7c4   : > { %v2713_v49 = vunpack.i.h.bf16 %v2711_v47  ;;  %v2712_v50 = vunpack.i.l.bf16 %v2711_v47 }
 0x7c5   : > { %2378 = vmatprep.subr.bf16.mxu1 %v2377_v48 }
 0x7c6   : > { %2380 = vmatpush1.bf16.msra.mxu1 %v2379_v46  ;;  %v1739_v51 = vsel %vm593_vm4, %v2712_v50, %v2713_v49  ;;  %v2863_v46 = vmov 3  }
 0x7c7   : > { %v2716_v54 = vpop.permute.xlu0 %2715  ;;  %v2381_v55 = vpack.c.bf16 %v1741_v52, %v1739_v51  ;;  %v1721_v61 = vpop.permute.xlu1 %1720 }
 0x7c8   : > { %v2718_v56 = vunpack.i.h.bf16 %v2716_v54  ;;  %v2717_v57 = vunpack.i.l.bf16 %v2716_v54  ;;  %v1742_v63 = vsel %vm593_vm4, %v1721_v61, %v1723_v53 }
 0x7c9   : > { %2382 = vmatprep.subr.bf16.mxu1 %v2381_v55 }
 0x7ca   : > { %v1738_v58 = vsel %vm593_vm4, %v2717_v57, %v2712_v50  ;;  %v1740_v59 = vsel %vm593_vm4, %v2718_v56, %v2697_v44 }
 0x7cb   : > { %v2383_v60 = vpack.c.bf16 %v1740_v59, %v1738_v58  ;;  %v1725_v10 = vpop.permute.xlu0 %1724 }
 0x7cc   : > { %v1743_v14 = vsel %vm593_vm4, %v1723_v53, %v1725_v10 }
 0x7cd   : > { %2384 = vmatpush1.bf16.msra.mxu1 %v2383_v60 }
 0x7ce   : > { %1781 = vmatprep.subr.mxu1 %v1743_v14 }
 0x7d1   : > { %1782 = vmatpush1.msra.mxu1 %v1742_v63 }
 0x7d2   : > { %2330 = vmatmul.mubr.msk.f32.vlgmr.msra.gmra.mrb[4].mxu1 %vm783_vm12, %v1668_v62 }
 0x8a5   : > { %v3336_v12 = vpop.f32.mrb[4].mxu1 }
 0x8a6   : > { %v1836_v11 = vmul.f32 %v3336_v12, %v3336_v12  ;;  %v3340_v15 = vpop.f32.mrb[5].mxu1 }
 0x8a7   : > { %v1837_v16 = vmul.f32 %v3340_v15, %v3340_v15  ;;  %v1838_v17 = vadd.f32 %v3340_v15, %v3336_v12 }
 0x8a9   : > { %v1841_v18 = vadd.f32 %v1837_v16, %v1836_v11  ;;  %1839 = vadd.xlane.f32.xlu0 %v1838_v17 }
 0x8ab   : > { %1842 = vadd.xlane.f32.xlu1 %v1841_v18 }
 0x8bc   : > { %1909 = vrot.lane.b32.xlu1 %v1904_v20, %s2847_s24 }
 0x8bf   : > { %1945 = vrot.lane.b32.xlu0 %v1883_v13, %s2850_s30 }
 0x8c0   : > { %1911 = vrot.lane.b32.xlu1 %v1908_v22, %s2847_s24 }
 0x8c4   : > { %1920 = vrot.lane.b32.xlu1 %v1883_v13, %s2848_s25 }
 0x8c8   : > { %1922 = vrot.lane.b32.xlu1 %v1887_v25, %s2848_s25 }
 0x8cc   : > { %1934 = vrot.lane.b32.xlu1 %v1904_v20, %s2849_s29 }
 0x8d0   : > { %1936 = vrot.lane.b32.xlu1 %v1908_v22, %s2849_s29 }
 0x8d4   : > { %1947 = vrot.lane.b32.xlu1 %v1887_v25, %s2850_s30 }
 0x936   : > { %v1840_v5 = vpop.xlane.xlu0 %1839 }
 0x937   : > { %v1844_v26 = vmul.f32 0.00390625, %v1840_v5 }
 0x938   : > { %v1843_v27 = vpop.xlane.xlu1 %1842 }
 0x939   : > { %v1846_v28 = vmul.f32 %v1844_v26, %v1844_v26  ;;  %v1845_v29 = vmul.f32 0.00390625, %v1843_v27 }
 0x93a   : > { %v1946_v47 = vpop.permute.xlu0 %1945 }
 0x93b   : > { %v1847_v30 = vsub.f32 %v1845_v29, %v1846_v28 }
 0x93c   : > { %v1910_v37 = vpop.permute.xlu1 %1909 }
 0x93d   : > { %v1849_v31 = vadd.f32 1e-05, %v1847_v30  ;;  %v1917_v42 = vmul.f32 0.0, %v1910_v37 }
 0x93f   : > { %2828 = vrsqrt.f32 %v1849_v31 }
 0x940   : > { %v1912_v38 = vpop.permute.xlu1 %1911 }
 0x941   : > { %v1913_v59 = vsel %vm542_vm1, %v1910_v37, %v1912_v38 }
 0x944   : > { %v1921_v39 = vpop.permute.xlu1 %1920 }
 0x945   : > { %v1928_v45 = vmul.f32 0.0, %v1921_v39 }
 0x948   : > { %v1923_v40 = vpop.permute.xlu1 %1922 }
 0x949   : > { %v2829_v32 = vpop.eup %2828  ;;  %v1924_v60 = vsel %vm554_vm0, %v1921_v39, %v1923_v40 }
 0x94a   : > { %v1851_v33 = vmul.f32 %v2829_v32, %v3367_v6 }
 0x94c   : > { %1857 = vperm.xlu0 %2719, %v1851_v33   ;;  %v1853_v35 = vmul.f32 %v1851_v33, %v1844_v26  ;;  %v1935_v41 = vpop.permute.xlu1 %1934 }
 0x94e   : > { %v1854_v36 = vsub.f32 %v3373_v34, %v1853_v35 }
 0x950   : > { %1864 = vperm.xlu1 %2720, %v1854_v36   ;;  %v1937_v43 = vpop.permute.xlu1 %1936  ;;  %2756 = vset.pattern.permute.xlu0 %v2863_v46 }
 0x951   : > { %v1944_v44 = vmul.f32 0.0, %v1937_v43  ;;  %v1938_v10 = vsel %vm569_vm2, %v1935_v41, %v1937_v43  ;;  %v3415_v43 = vld [vmem:[%s3500_s9] sm:$0xff] }
 0x954   : > { %2757 = vset.pattern.permute.xlu1 %v2863_v46  ;;  %v1948_v48 = vpop.permute.xlu1 %1947 }
 0x955   : > { %v1949_v14 = vsel %vm581_vm3, %v1946_v47, %v1948_v48  ;;  %v1955_v19 = vmul.f32 0.0, %v1948_v48 }
 0x96b   : > { %1356 = vadd.xlane.f32.xlu0 %v1355_v3 }
 0x974   : > { %1359 = vadd.xlane.f32.xlu1 %v1358_v8 }
 0x981   : > { %1956 = vrot.lane.b32.xlu0 %v1904_v20, %s2851_s12 }
 0x985   : > { %1958 = vrot.lane.b32.xlu1 %v1908_v22, %s2851_s12  ;;  %1888 = vrot.lane.b32.xlu0 %v1883_v13, %s2852_s13 }
 0x989   : > { %1890 = vrot.lane.b32.xlu1 %v1887_v25, %s2852_s13  ;;  %1981 = vrot.lane.b32.xlu0 %v1917_v42, %s2854_s15 }
 0x98d   : > { %1970 = vrot.lane.b32.xlu1 %v2846_v1, %s2848_s25  ;;  %2012 = vrot.lane.b32.xlu0 %v1944_v44, %s2856_s19 }
 0x991   : > { %1992 = vrot.lane.b32.xlu1 %v1928_v45, %s2853_s14 }
 0x9cb   : > { %v1858_v49 = vpop.permute.xlu0 %1857 }
 0x9cc   : > { %v1860_v50 = vmul.f32 %v1858_v49, %v3336_v12  ;;  %v1861_v51 = vmul.f32 %v1858_v49, %v3340_v15 }
 0x9cf   : > { %v1865_v52 = vpop.permute.xlu1 %1864 }
 0x9d0   : > { %v1867_v53 = vadd.f32 %v1865_v52, %v1860_v50  ;;  %v1868_v54 = vadd.f32 %v1865_v52, %v1861_v51 }
 0x9d2   : > { %v1869_v55 = vmul.f32 0.01, %v1867_v53  ;;  %v1870_v56 = vmul.f32 0.01, %v1868_v54 }
 0x9d4   : > { %v1871_v57 = vmax.f32 %v1867_v53, %v1869_v55  ;;  %v1872_v58 = vmax.f32 %v1868_v54, %v1870_v56 }
 0x9d6   : > { %v2736_v61 = vpack.i.bf16 %v1872_v58, %v1871_v57  ;;  %v1929_v62 = vmul.f32 %v1924_v60, %v1871_v57  ;;  %v1930_v63 = vmul.f32 %v1923_v40, %v1872_v58  ;;  %v1942_v3 = vmul.f32 %v1935_v41, %v1871_v57  ;;  %v3409_v40 = vld [vmem:[%s3499_s8] sm:$0xff] }
 0x9d7   : > { %v1943_v4 = vmul.f32 %v1938_v10, %v1872_v58  ;;  %v1918_v7 = vmul.f32 %v1913_v59, %v1871_v57  ;;  %v1919_v8 = vmul.f32 %v1912_v38, %v1872_v58  ;;  %v1953_v12 = vmul.f32 %v1946_v47, %v1871_v57 }
 0x9d8   : > { %2737 = vrot.lane.b32.xlu1 %v2736_v61, %s2855_s16  ;;  %2722 = vrot.lane.b32.xlu0 %v2736_v61, %s2848_s25  ;;  %v2741_v11 = vpack.i.bf16 %v1930_v63, %v1929_v62  ;;  %v1954_v15 = vmul.f32 %v1949_v14, %v1872_v58 }
 0x9d9   : > { %v2746_v16 = vpack.i.bf16 %v1943_v4, %v1942_v3  ;;  %v2731_v17 = vpack.i.bf16 %v1919_v8, %v1918_v7 }
 0x9da   : > { %v2751_v18 = vpack.i.bf16 %v1954_v15, %v1953_v12 }
 0x9dc   : > { %2727 = vrot.lane.b32.xlu0 %v2736_v61, %s2852_s13  ;;  %2742 = vrot.lane.b32.xlu1 %v2741_v11, %s2853_s14 }
 0x9e0   : > { %2747 = vrot.lane.b32.xlu1 %v2746_v16, %s2856_s19  ;;  %2732 = vrot.lane.b32.xlu0 %v2731_v17, %s2854_s15 }
 0x9e4   : > { %2752 = vrot.lane.b32.xlu1 %v2751_v18, %s2857_s20  ;;  %2023 = vrot.lane.b32.xlu0 %v1955_v19, %s2857_s20  ;;  %s3507_s20 = sshll.u32 %s3509_s18, 4 }
 0x9e5   : > { %s386_s28 = scalar_lea.vmem %s3502_s11, %s3507_s20 }
 0x9e8   : > { %2034 = vrot.lane.b32.xlu0 %v2846_v1, %s2855_s16 }
 0x9f8   : > { %v1357_v20 = vpop.xlane.xlu0 %1356 }
 0x9f9   : > { %v1361_v13 = vmul.f32 0.00390625, %v1357_v20 }
 0x9fb   : > { %v1363_v25 = vmul.f32 %v1361_v13, %v1361_v13 }
 0x9fc   : > { %v1957_v21 = vpop.permute.xlu0 %1956 }
 0x9fd   : > { %v1964_v22 = vmul.f32 %v1957_v21, %v1871_v57 }
 0x9ff   : > { %2041 = vrot.lane.b32.xlu1 %v1964_v22, %s3506_s22 }
 0xa00   : > { %v1889_v32 = vpop.permute.xlu0 %1888 }
 0xa01   : > { %v1360_v24 = vpop.xlane.xlu1 %1359  ;;  %v1896_v49 = vmul.f32 0.0, %v1889_v32 }
 0xa02   : > { %v1362_v5 = vmul.f32 0.00390625, %v1360_v24 }
 0xa04   : > { %v1364_v26 = vsub.f32 %v1362_v5, %v1363_v25  ;;  %v1982_v46 = vpop.permute.xlu0 %1981 }
 0xa05   : > { %v1959_v27 = vpop.permute.xlu1 %1958 }
 0xa06   : > { %v1365_v28 = vadd.f32 1e-05, %v1364_v26  ;;  %v1960_v29 = vsel %vm593_vm4, %v1957_v21, %v1959_v27  ;;  %v1966_v30 = vmul.f32 0.0, %v1959_v27 }
 0xa07   : > { %v1965_v31 = vmul.f32 %v1960_v29, %v1872_v58 }
 0xa08   : > { %2830 = vrsqrt.f32 %v1365_v28  ;;  %2045 = vrot.lane.b32.xlu1 %v1966_v30, %s3506_s22  ;;  %v2013_v48 = vpop.permute.xlu0 %2012 }
 0xa09   : > { %2043 = vrot.lane.b32.xlu0 %v1965_v31, %s3506_s22  ;;  %v1891_v33 = vpop.permute.xlu1 %1890 }
 0xa0a   : > { %v1892_v35 = vsel %vm519_vm5, %v1889_v32, %v1891_v33  ;;  %v1898_v36 = vmul.f32 %v1891_v33, %v1872_v58 }
 0xa0b   : > { %v1897_v37 = vmul.f32 %v1892_v35, %v1871_v57 }
 0xa0d   : > { %v2758_v38 = vpack.i.bf16 %v1898_v36, %v1897_v37  ;;  %v1971_v45 = vpop.permute.xlu1 %1970 }
 0xa11   : > { %v1993_v47 = vpop.permute.xlu1 %1992 }
 0xa12   : > { %v2831_v39 = vpop.eup %2830 }
 0xa13   : > { %v1367_v41 = vmul.f32 %v3409_v40, %v2831_v39 }
 0xa15   : > { %1372 = vperm.xlu0 %2756, %v1367_v41   ;;  %v1368_v42 = vmul.f32 %v1367_v41, %v1361_v13 }
 0xa17   : > { %v1369_v44 = vsub.f32 %v3415_v43, %v1368_v42 }
 0xa19   : > { %1379 = vperm.xlu1 %2757, %v1369_v44  }
 0xa1d   : > { %2759 = vrot.lane.b32.xlu1 %v2758_v38, %s2851_s12 }
 0xa4a   : > { %v2723_v50 = vpop.permute.xlu0 %2722  ;;  %v2738_v51 = vpop.permute.xlu1 %2737 }
 0xa4b   : > { %v2725_v52 = vunpack.i.h.bf16 %v2723_v50  ;;  %v2724_v53 = vunpack.i.l.bf16 %v2723_v50  ;;  %v2740_v22 = vunpack.i.h.bf16 %v2738_v51  ;;  %v2739_v13 = vunpack.i.l.bf16 %v2738_v51 }
 0xa4d   : > { %v1977_v54 = vsel %vm554_vm0, %v2724_v53, %v2725_v52  ;;  %v1976_v55 = vsel %vm554_vm0, %v1971_v45, %v2724_v53  ;;  %v2036_v32 = vsel %vm674_vm8, %v2739_v13, %v2740_v22  ;;  %v1384_v53 = vld [vmem:[%s3496_s5] sm:$0xff] }
 0xa4e   : > { %v2763_v56 = vpack.i.bf16 %v2725_v52, %v1977_v54  ;;  %v2768_v57 = vpack.i.bf16 %v1976_v55, %v1896_v49  ;;  %v2728_v58 = vpop.permute.xlu0 %2727  ;;  %v2743_v59 = vpop.permute.xlu1 %2742 }
 0xa4f   : > { %v2730_v60 = vunpack.i.h.bf16 %v2728_v58  ;;  %v2729_v10 = vunpack.i.l.bf16 %v2728_v58  ;;  %v2745_v14 = vunpack.i.h.bf16 %v2743_v59  ;;  %v2744_v61 = vunpack.i.l.bf16 %v2743_v59 }
 0xa50   : > { %2764 = vrot.lane.b32.xlu0 %v2763_v56, %s2851_s12  ;;  %2769 = vrot.lane.b32.xlu1 %v2768_v57, %s2851_s12 }
 0xa51   : > { %v2004_v62 = vsel %vm519_vm5, %v2729_v10, %v2730_v60  ;;  %v1999_v7 = vsel %vm633_vm6, %v2744_v61, %v2745_v14  ;;  %v1998_v24 = vsel %vm633_vm6, %v1993_v47, %v2744_v61 }
 0xa52   : > { %v2773_v63 = vpack.i.bf16 %v2730_v60, %v2004_v62  ;;  %v2733_v3 = vpop.permute.xlu0 %2732  ;;  %v2748_v4 = vpop.permute.xlu1 %2747  ;;  %v2783_v15 = vpack.i.bf16 %v2745_v14, %v1999_v7 }
 0xa53   : > { %v2735_v8 = vunpack.i.h.bf16 %v2733_v3  ;;  %v2734_v12 = vunpack.i.l.bf16 %v2733_v3  ;;  %v2750_v17 = vunpack.i.h.bf16 %v2748_v4  ;;  %v2749_v18 = vunpack.i.l.bf16 %v2748_v4 }
 0xa54   : > { %2774 = vrot.lane.b32.xlu1 %v2773_v63, %s2851_s12 }
 0xa55   : > { %v1988_v11 = vsel %vm621_vm7, %v2734_v12, %v2735_v8  ;;  %v1987_v20 = vsel %vm621_vm7, %v1982_v46, %v2734_v12  ;;  %v2015_v5 = vsel %vm650_vm9, %v2750_v17, %v2013_v48  ;;  %v2788_v26 = vpack.i.bf16 %v2749_v18, %v2729_v10 }
 0xa56   : > { %v2778_v16 = vpack.i.bf16 %v2735_v8, %v1988_v11  ;;  %v2024_v19 = vpop.permute.xlu0 %2023  ;;  %v2753_v21 = vpop.permute.xlu1 %2752  ;;  %v2798_v25 = vpack.i.bf16 %v1998_v24, %v1987_v20  ;;  %v2014_v28 = vsel %vm650_vm9, %v2749_v18, %v2750_v17 }
 0xa57   : > { %v2755_v29 = vunpack.i.h.bf16 %v2753_v21  ;;  %v2754_v30 = vunpack.i.l.bf16 %v2753_v21  ;;  %v2803_v33 = vpack.i.bf16 %v2015_v5, %v2014_v28 }
 0xa58   : > { %2779 = vrot.lane.b32.xlu0 %v2778_v16, %s2851_s12  ;;  %2784 = vrot.lane.b32.xlu1 %v2783_v15, %s2851_s12 }
 0xa59   : > { %v2026_v36 = vsel %vm662_vm10, %v2755_v29, %v2024_v19  ;;  %v2025_v37 = vsel %vm662_vm10, %v2754_v30, %v2755_v29  ;;  %v2813_v39 = vpack.i.bf16 %v2739_v13, %v2754_v30 }
 0xa5a   : > { %v2035_v27 = vpop.permute.xlu0 %2034  ;;  %v2808_v38 = vpack.i.bf16 %v2026_v36, %v2025_v37 }
 0xa5b   : > { %v2037_v31 = vsel %vm674_vm8, %v2740_v22, %v2035_v27 }
 0xa5c   : > { %2789 = vrot.lane.b32.xlu1 %v2788_v26, %s2851_s12  ;;  %2799 = vrot.lane.b32.xlu0 %v2798_v25, %s2851_s12  ;;  %v2793_v35 = vpack.i.bf16 %v2037_v31, %v2036_v32 }
 0xa60   : > { %2804 = vrot.lane.b32.xlu0 %v2803_v33, %s2851_s12  ;;  %2794 = vrot.lane.b32.xlu1 %v2793_v35, %s2851_s12 }
 0xa64   : > { %2809 = vrot.lane.b32.xlu0 %v2808_v38, %s2851_s12 }
 0xa68   : > { %2814 = vrot.lane.b32.xlu0 %v2813_v39, %s2851_s12 }
 0xa71   : > { %v2042_v41 = vpop.permute.xlu1 %2041 }
 0xa7a   : > { %v2046_v42 = vpop.permute.xlu1 %2045 }
 0xa7b   : > { %v2044_v44 = vpop.permute.xlu0 %2043 }
 0xa7c   : > { %v2047_v45 = vsel %vm686_vm11, %v2042_v41, %v2044_v44  ;;  %v2048_v46 = vsel %vm686_vm11, %v2044_v44, %v2046_v42 }
 0xa7d   : > { %2103 = vrot.lane.b32.xlu1 %v2047_v45, %s2851_s12  ;;  %2105 = vrot.lane.b32.xlu0 %v2048_v46, %s2851_s12 }
 0xa81   : > { %2101 = vrot.lane.b32.xlu1 %v2042_v41, %s2851_s12 }
 0xa94   : > { %v1373_v47 = vpop.permute.xlu0 %1372 }
 0xa95   : > { %v1375_v48 = vmul.f32 %v1373_v47, %v3326_v0  ;;  %v1376_v49 = vmul.f32 %v1373_v47, %v3328_v2 }
 0xa98   : > { %v1380_v50 = vpop.permute.xlu1 %1379 }
 0xa99   : > { %v1382_v51 = vadd.f32 %v1380_v50, %v1375_v48  ;;  %v1383_v52 = vadd.f32 %v1380_v50, %v1376_v49 }
 0xa9b   : > { %1388 = vmatprep.subr.mxu0 %v1383_v52 }
 0xa9c   : > { %1389 = vmatpush1.msra.mxu0 %v1382_v51  ;;  %v2760_v54 = vpop.permute.xlu1 %2759 }
 0xa9d   : > { %2328 = vmatmul.mubr.msk.f32.vlgmr.msra.gmra.mrb[4].mxu0 %vm392_vm13, %v1384_v53  ;;  %v2762_v55 = vunpack.i.h.bf16 %v2760_v54  ;;  %v2761_v56 = vunpack.i.l.bf16 %v2760_v54 }
 0xa9e   : > { %2210 = vmatprep.mubr.f32.mxu0 %v2846_v1 }
 0xa9f   : > { %v2108_v61 = vsel %vm593_vm4, %v2761_v56, %v2762_v55 }
 0xac2   : > { %v2765_v57 = vpop.permute.xlu0 %2764  ;;  %v2770_v0 = vpop.permute.xlu1 %2769 }
 0xac3   : > { %v2767_v58 = vunpack.i.h.bf16 %v2765_v57  ;;  %v2766_v2 = vunpack.i.l.bf16 %v2765_v57  ;;  %v2772_v59 = vunpack.i.h.bf16 %v2770_v0  ;;  %v2771_v60 = vunpack.i.l.bf16 %v2770_v0 }
 0xac5   : > { %v2109_v10 = vsel %vm593_vm4, %v2772_v59, %v2766_v2  ;;  %v2107_v14 = vsel %vm593_vm4, %v2771_v60, %v2761_v56  ;;  %v2110_v62 = vsel %vm593_vm4, %v2766_v2, %v2767_v58  ;;  %v2049_v2 = vld [vmem:[%s3498_s7] sm:$0xff] }
 0xac6   : > { %v2387_v63 = vpack.c.bf16 %v2109_v10, %v2107_v14  ;;  %v2775_v3 = vpop.permute.xlu1 %2774  ;;  %v2385_v1 = vpack.c.bf16 %v2110_v62, %v2108_v61 }
 0xac7   : > { %v2777_v13 = vunpack.i.h.bf16 %v2775_v3  ;;  %v2776_v24 = vunpack.i.l.bf16 %v2775_v3  ;;  %v2864_v3 = vmov 4  }
 0xac8   : > { %2386 = vmatprep.subr.bf16.mxu0 %v2385_v1  ;;  %2818 = vset.pattern.permute.xlu1 %v2864_v3 }
 0xac9   : > { %2388 = vmatpush1.bf16.msra.mxu0 %v2387_v63  ;;  %v2116_v35 = vsel %vm593_vm4, %v2776_v24, %v2777_v13  ;;  %2819 = vset.pattern.permute.xlu0 %v2864_v3 }
 0xaca   : > { %v2780_v4 = vpop.permute.xlu0 %2779  ;;  %v2785_v7 = vpop.permute.xlu1 %2784 }
 0xacb   : > { %v2782_v8 = vunpack.i.h.bf16 %v2780_v4  ;;  %v2781_v12 = vunpack.i.l.bf16 %v2780_v4  ;;  %v2787_v11 = vunpack.i.h.bf16 %v2785_v7  ;;  %v2786_v15 = vunpack.i.l.bf16 %v2785_v7 }
 0xacd   : > { %v2112_v16 = vsel %vm593_vm4, %v2781_v12, %v2782_v8  ;;  %v2114_v17 = vsel %vm593_vm4, %v2786_v15, %v2787_v11 }
 0xace   : > { %v2790_v18 = vpop.permute.xlu1 %2789  ;;  %v2800_v19 = vpop.permute.xlu0 %2799  ;;  %v2389_v20 = vpack.c.bf16 %v2114_v17, %v2112_v16 }
 0xacf   : > { %v2802_v21 = vunpack.i.h.bf16 %v2800_v19  ;;  %v2801_v22 = vunpack.i.l.bf16 %v2800_v19  ;;  %v2791_v25 = vunpack.i.l.bf16 %v2790_v18  ;;  %v2792_v30 = vunpack.i.h.bf16 %v2790_v18 }
 0xad0   : > { %2390 = vmatprep.subr.bf16.mxu0 %v2389_v20 }
 0xad1   : > { %v2113_v5 = vsel %vm593_vm4, %v2802_v21, %v2786_v15  ;;  %v2111_v26 = vsel %vm593_vm4, %v2801_v22, %v2781_v12  ;;  %v2115_v33 = vsel %vm593_vm4, %v2791_v25, %v2776_v24 }
 0xad2   : > { %v2391_v27 = vpack.c.bf16 %v2113_v5, %v2111_v26  ;;  %v2805_v28 = vpop.permute.xlu0 %2804  ;;  %v2795_v29 = vpop.permute.xlu1 %2794  ;;  %v2865_v5 = vmov 6  }
 0xad3   : > { %v2807_v31 = vunpack.i.h.bf16 %v2805_v28  ;;  %v2806_v32 = vunpack.i.l.bf16 %v2805_v28  ;;  %v2797_v37 = vunpack.i.h.bf16 %v2795_v29  ;;  %v2796_v38 = vunpack.i.l.bf16 %v2795_v29 }
 0xad4   : > { %2392 = vmatpush1.bf16.msra.mxu0 %v2391_v27 }
 0xad5   : > { %v2117_v36 = vsel %vm593_vm4, %v2792_v30, %v2806_v32  ;;  %v2118_v39 = vsel %vm593_vm4, %v2806_v32, %v2807_v31  ;;  %v2122_v48 = vsel %vm593_vm4, %v2796_v38, %v2797_v37 }
 0xad6   : > { %v2395_v41 = vpack.c.bf16 %v2117_v36, %v2115_v33  ;;  %v2810_v42 = vpop.permute.xlu0 %2809  ;;  %v2393_v44 = vpack.c.bf16 %v2118_v39, %v2116_v35 }
 0xad7   : > { %v2812_v45 = vunpack.i.h.bf16 %v2810_v42  ;;  %v2811_v46 = vunpack.i.l.bf16 %v2810_v42 }
 0xad8   : > { %2394 = vmatprep.subr.bf16.mxu0 %v2393_v44 }
 0xad9   : > { %2396 = vmatpush1.bf16.msra.mxu0 %v2395_v41  ;;  %v2120_v47 = vsel %vm593_vm4, %v2811_v46, %v2812_v45 }
 0xada   : > { %v2815_v49 = vpop.permute.xlu0 %2814  ;;  %v2397_v50 = vpack.c.bf16 %v2122_v48, %v2120_v47 }
 0xadb   : > { %v2817_v51 = vunpack.i.h.bf16 %v2815_v49  ;;  %v2816_v52 = vunpack.i.l.bf16 %v2815_v49 }
 0xadc   : > { %2398 = vmatprep.subr.bf16.mxu0 %v2397_v50 }
 0xadd   : > { %v2121_v53 = vsel %vm593_vm4, %v2817_v51, %v2796_v38  ;;  %v2119_v54 = vsel %vm593_vm4, %v2816_v52, %v2811_v46 }
 0xade   : > { %v2399_v55 = vpack.c.bf16 %v2121_v53, %v2119_v54 }
 0xae0   : > { %2400 = vmatpush1.bf16.msra.mxu0 %v2399_v55 }
 0xaef   : > { %v2104_v56 = vpop.permute.xlu1 %2103  ;;  %v2106_v57 = vpop.permute.xlu0 %2105 }
 0xaf0   : > { %v2124_v0 = vsel %vm593_vm4, %v2104_v56, %v2106_v57 }
 0xaf1   : > { %2162 = vmatprep.subr.mxu0 %v2124_v0 }
 0xaf3   : > { %v2102_v58 = vpop.permute.xlu1 %2101 }
 0xaf4   : > { %v2123_v59 = vsel %vm593_vm4, %v2102_v58, %v2104_v56 }
 0xaf5   : > { %2163 = vmatpush1.msra.mxu0 %v2123_v59 }
 0xaf6   : > { %2332 = vmatmul.mubr.msk.f32.vlgmr.msra.gmra.mrb[6].mxu0 %vm783_vm12, %v2049_v2 }
 0xb70   : > { %v1454_v60 = vpop.f32.mrb[4].mxu0 }
 0xb71   : > { %v1459_v10 = vmul.f32 %v1454_v60, %v1454_v60  ;;  %v1456_v14 = vpop.f32.mrb[5].mxu0 }
 0xb72   : > { %v1460_v61 = vmul.f32 %v1456_v14, %v1456_v14  ;;  %v1461_v62 = vadd.f32 %v1456_v14, %v1454_v60 }
 0xb74   : > { %1462 = vadd.xlane.f32.xlu0 %v1461_v62  ;;  %v1464_v63 = vadd.f32 %v1460_v61, %v1459_v10 }
 0xb76   : > { %1465 = vadd.xlane.f32.xlu1 %v1464_v63 }
 0xbc9   : > { %v2212_v1 = vpop.f32.mrb[6].mxu0 }
 0xbca   : > { %v2217_v4 = vmul.f32 %v2212_v1, %v2212_v1  ;;  %v2214_v7 = vpop.f32.mrb[7].mxu0 }
 0xbcb   : > { %v2218_v8 = vmul.f32 %v2214_v7, %v2214_v7  ;;  %v2219_v12 = vadd.f32 %v2214_v7, %v2212_v1 }
 0xbcd   : > { %v2222_v11 = vadd.f32 %v2218_v8, %v2217_v4  ;;  %2220 = vadd.xlane.f32.xlu0 %v2219_v12 }
 0xbd1   : > { %2223 = vadd.xlane.f32.xlu0 %v2222_v11 }
 0xc01   : > { %v1463_v15 = vpop.xlane.xlu0 %1462 }
 0xc02   : > { %v1467_v16 = vmul.f32 0.00390625, %v1463_v15 }
 0xc03   : > { %v1466_v17 = vpop.xlane.xlu1 %1465 }
 0xc04   : > { %v1469_v18 = vmul.f32 %v1467_v16, %v1467_v16  ;;  %v1468_v19 = vmul.f32 0.00390625, %v1466_v17 }
 0xc06   : > { %v1470_v20 = vsub.f32 %v1468_v19, %v1469_v18 }
 0xc08   : > { %v1471_v21 = vadd.f32 1e-05, %v1470_v20 }
 0xc0a   : > { %2832 = vrsqrt.f32 %v1471_v21 }
 0xc14   : > { %v2833_v22 = vpop.eup %2832 }
 0xc15   : > { %v1473_v13 = vmul.f32 %v3409_v40, %v2833_v22 }
 0xc17   : > { %1478 = vperm.xlu1 %2818, %v1473_v13   ;;  %v1474_v24 = vmul.f32 %v1473_v13, %v1467_v16 }
 0xc19   : > { %v1475_v25 = vsub.f32 %v3415_v43, %v1474_v24 }
 0xc1b   : > { %1485 = vperm.xlu0 %2819, %v1475_v25   ;;  %2820 = vset.pattern.permute.xlu1 %v2865_v5 }
 0xc1f   : > { %2821 = vset.pattern.permute.xlu0 %v2865_v5 }
 0xc5a   : > { %v2221_v26 = vpop.xlane.xlu0 %2220 }
 0xc5b   : > { %v2225_v27 = vmul.f32 0.00390625, %v2221_v26 }
 0xc5d   : > { %v2227_v29 = vmul.f32 %v2225_v27, %v2225_v27 }
 0xc5e   : > { %v2224_v28 = vpop.xlane.xlu0 %2223 }
 0xc5f   : > { %v2226_v30 = vmul.f32 0.00390625, %v2224_v28 }
 0xc61   : > { %v2228_v31 = vsub.f32 %v2226_v30, %v2227_v29 }
 0xc63   : > { %v2230_v32 = vadd.f32 1e-05, %v2228_v31 }
 0xc65   : > { %2834 = vrsqrt.f32 %v2230_v32 }
 0xc6f   : > { %v2835_v33 = vpop.eup %2834 }
 0xc70   : > { %v2232_v35 = vmul.f32 %v2835_v33, %v3367_v6 }
 0xc72   : > { %2238 = vperm.xlu1 %2820, %v2232_v35   ;;  %v2234_v40 = vmul.f32 %v2232_v35, %v2225_v27 }
 0xc74   : > { %v2235_v36 = vsub.f32 %v3373_v34, %v2234_v40 }
 0xc76   : > { %2245 = vperm.xlu1 %2820, %v2235_v36  }
 0xc96   : > { %v1479_v43 = vpop.permute.xlu1 %1478 }
 0xc97   : > { %v1481_v38 = vmul.f32 %v1479_v43, %v1454_v60  ;;  %v1482_v39 = vmul.f32 %v1479_v43, %v1456_v14 }
 0xc9a   : > { %v1486_v37 = vpop.permute.xlu0 %1485 }
 0xc9b   : > { %v1488_v42 = vadd.f32 %v1486_v37, %v1481_v38  ;;  %v1489_v44 = vadd.f32 %v1486_v37, %v1482_v39 }
 0xc9d   : > { %v1490_v48 = vadd.f32 %v1488_v42, %v3227_v23  ;;  %v1491_v6 = vadd.f32 %v1489_v44, %v3229_v9 }
 0xcf1   : > { %v2239_v41 = vpop.permute.xlu1 %2238 }
 0xcf2   : > { %v2241_v45 = vmul.f32 %v2239_v41, %v2212_v1  ;;  %v2242_v46 = vmul.f32 %v2239_v41, %v2214_v7 }
 0xcf5   : > { %v2246_v47 = vpop.permute.xlu1 %2245 }
 0xcf6   : > { %v2248_v49 = vadd.f32 %v2246_v47, %v2241_v45  ;;  %v2249_v50 = vadd.f32 %v2246_v47, %v2242_v46 }
 0xcf8   : > { %v2250_v51 = vadd.f32 %v2248_v49, %v1490_v48  ;;  %v2251_v34 = vadd.f32 %v2249_v50, %v1491_v6 }
 0xcfa   : > { %v2252_v52 = vmul.f32 0.01, %v2250_v51  ;;  %v2253_v53 = vmul.f32 0.01, %v2251_v34 }
 0xcfc   : > { %v2254_v54 = vmax.f32 %v2250_v51, %v2252_v52  ;;  %v2255_v55 = vmax.f32 %v2251_v34, %v2253_v53 }
 0xcfe   : > { %2256 = vst [vmem:[%s386_s28] sm:$0xff] %v2254_v54  ;;  %2257 = vst [vmem:[%s386_s28 + $0x8] sm:$0xff] %v2255_v55 }
 0xcff PF: > { %s21_s17 = sadd.s32 1, %s2844_s17  }
 0xd00   : > { %p18_p4 = scmp.ge.s32.totalorder %s21_s17, 4  }
 0xd02   :  { %20 = sbr.rel (!%p18_p4) target bundleno = 1 (0x1), region = 95 }

</bundles_post_ra>
